<compile_context>
chip_gen: v7x
topology: tpu7x:2x2x1
jax: 0.10.0
libtpu: 0.0.40
codegen_flags: <defaults>
</compile_context>

<pallas_src>
import functools

import jax
import jax.numpy as jnp
from jax.experimental import pallas as pl
from jax.experimental.pallas import tpu as pltpu


def lstm_decoder_kernel(h0_ref, c0_ref, h1_ref, x0_ref, a0_ref,
                        whh0_ref, wih1_ref, whh1_ref, b1_ref,
                        wfold_ref, bfold_ref, wout_ref, bout_ref,
                        scale_ref, offset_ref,
                        pre_out_ref, prec_out_ref):
    H = h0_ref.shape[-1]
    In = x0_ref.shape[-1]
    B = h0_ref.shape[0]
    G = 4 * H
    seq_len = pre_out_ref.shape[-1] // In

    # ---- Loop-invariant loads: weights resident for all frames (bf16) ----
    whh0 = whh0_ref[...]          # (H, 4H)  g-columns pre-scaled x2
    wih1 = wih1_ref[...]          # (H, 4H)
    whh1 = whh1_ref[...]          # (H, 4H)
    wfold = wfold_ref[...]        # (H, 4H)  = Wout @ Wih0s (f32 compose, bf16)
    wout = wout_ref[...]          # (H, In)

    # ---- Hoisted broadcasts of per-frame constants (done once, not 8x) ----
    b1 = jnp.broadcast_to(b1_ref[...], (B, G))
    bfold = jnp.broadcast_to(bfold_ref[...], (B, G))
    bout = jnp.broadcast_to(bout_ref[...], (B, In))
    a_scale = jnp.broadcast_to(scale_ref[...], (B, G))   # 2 on g lanes, else 1
    a_off = jnp.broadcast_to(offset_ref[...], (B, G))    # -1 on g lanes, else 0

    def activate(gates):
        # One EUP pass over all 4H lanes; tanh on the g lanes recovered with a
        # constant FMA (g columns of W/b were pre-scaled by 2 in the wrapper).
        s = jax.nn.sigmoid(gates)
        act = s * a_scale + a_off
        i = act[:, 0 * H:1 * H]
        f = act[:, 1 * H:2 * H]
        g = act[:, 2 * H:3 * H]
        o = act[:, 3 * H:4 * H]
        return i, f, g, o

    # ---- Recurrent state: h resident in bf16 (MXU dtype), c in f32 ----
    h0 = h0_ref[...].astype(jnp.bfloat16)
    h1 = h1_ref[...].astype(jnp.bfloat16)
    c0 = c0_ref[...]
    c1 = c0_ref[...]              # c_h[1] init == mean(cell_states) == c0 init
    a = a0_ref[...]               # x-contribution to gates0 (incl. b0), f32

    h1s = []
    cs = []
    for _ in range(seq_len):      # static unroll; seq_len is small and static
        # LSTMCell 0: gates0 = (x @ Wih0 + b0) + h0 @ Whh0  (x-part == a)
        g0 = a + jnp.dot(h0, whh0, preferred_element_type=jnp.float32)
        i0, f0, gg0, o0 = activate(g0)
        c0 = f0 * c0 + i0 * gg0
        h0 = (o0 * jnp.tanh(c0)).astype(jnp.bfloat16)

        # LSTMCell 1: two accumulating matmuls (no concat relayout)
        g1 = (jnp.dot(h0, wih1, preferred_element_type=jnp.float32)
              + jnp.dot(h1, whh1, preferred_element_type=jnp.float32) + b1)
        i1, f1, gg1, o1 = activate(g1)
        c1 = f1 * c1 + i1 * gg1
        h1 = (o1 * jnp.tanh(c1)).astype(jnp.bfloat16)

        # Folded output projection: next frame's gates0 x-contribution.
        #   x_{t+1} @ Wih0 = x_t @ Wih0 + h1 @ (Wout @ Wih0) + bout @ Wih0
        a = a + jnp.dot(h1, wfold, preferred_element_type=jnp.float32) + bfold

        h1s.append(h1)
        cs.append(c1)

    # ---- Deferred output projections (off the recurrence critical chain) ----
    prev = x0_ref[...]
    pres = []
    for t in range(seq_len):
        q = jnp.dot(h1s[t], wout, preferred_element_type=jnp.float32) + bout
        prev = q + prev           # pre_t = h1_t @ Wout + bout + pre_{t-1}
        pres.append(prev)

    # Single lane-dense writeback (lane widths seq_out*In and seq_out*H).
    pre_out_ref[...] = jnp.concatenate(pres, axis=-1)
    prec_out_ref[...] = jnp.concatenate(cs, axis=-1)


def _full_spec(shape):
    zeros = (0,) * len(shape)
    return pl.BlockSpec(shape, lambda i, _z=zeros: _z)


def lstm_decoder_pallas(hidden_states, cell_states, global_t_state, p, params,
                        seq_length_out):
    B, _, H = hidden_states.shape
    In = p.shape[-1]
    G = 4 * H

    # Initial-state time reductions hoisted out of the kernel (cheap XLA ops).
    h0_init = jnp.mean(hidden_states, axis=1)
    c0_init = jnp.mean(cell_states, axis=1)
    h1_init = jnp.mean(
        jnp.concatenate((global_t_state, hidden_states), axis=1), axis=1)
    x0 = p[:, 0, :]

    # Pre-scale the g-gate columns by 2 so one sigmoid pass covers all four
    # gates in-kernel (tanh(z) = 2*sigmoid(2z) - 1, recovered with an FMA).
    # Power-of-two scaling is exact in f32 and bf16.
    col_scale = jnp.concatenate([jnp.ones((2 * H,), jnp.float32),
                                 jnp.full((H,), 2.0, jnp.float32),
                                 jnp.ones((H,), jnp.float32)])
    act_scale = col_scale.reshape(1, G)
    act_offset = jnp.concatenate([jnp.zeros((2 * H,), jnp.float32),
                                  jnp.full((H,), -1.0, jnp.float32),
                                  jnp.zeros((H,), jnp.float32)]).reshape(1, G)

    wih0s = params["wih0"] * col_scale                       # (In, 4H) f32
    whh0s = (params["whh0"] * col_scale).astype(jnp.bfloat16)
    wih1s = (params["wih1"] * col_scale).astype(jnp.bfloat16)
    whh1s = (params["whh1"] * col_scale).astype(jnp.bfloat16)
    b0s = params["b0"] * col_scale                           # (1, 4H) f32
    b1s = params["b1"] * col_scale                           # (1, 4H) f32

    # Fold the output projection into the cell-0 input weights (f32 compose,
    # single cast to bf16); seed the running gates0 x-accumulator in f32.
    wfold = jnp.dot(params["wout"], wih0s).astype(jnp.bfloat16)   # (H, 4H)
    bfold = jnp.dot(params["bout"], wih0s)                        # (1, 4H)
    a0 = jnp.dot(x0, wih0s) + b0s                                 # (B, 4H)

    wout_bf = params["wout"].astype(jnp.bfloat16)                 # (H, In)

    args = (h0_init, c0_init, h1_init, x0, a0,
            whh0s, wih1s, whh1s, b1s,
            wfold, bfold, wout_bf, params["bout"],
            act_scale, act_offset)

    out_shape = (jax.ShapeDtypeStruct((B, seq_length_out * In), jnp.float32),
                 jax.ShapeDtypeStruct((B, seq_length_out * H), jnp.float32))

    pre_flat, prec_flat = pl.pallas_call(
        lstm_decoder_kernel,
        out_shape=out_shape,
        grid=(1,),
        in_specs=[_full_spec(a.shape) for a in args],
        out_specs=(_full_spec(out_shape[0].shape),
                   _full_spec(out_shape[1].shape)),
        compiler_params=pltpu.CompilerParams(
            dimension_semantics=("arbitrary",)),
    )(*args)

    pre = pre_flat.reshape(B, seq_length_out, In)        # (B, seq_out, input)
    pre_c = prec_flat.reshape(B, seq_length_out, H)      # (B, seq_out, hidden)
    return pre, pre_c


def lstm_decoder_reference(hidden_states, cell_states, global_t_state, p,
                           params, seq_length_out):
    """Pure-JAX (f32) reference matching the PyTorch forward semantics."""
    B, _, H = hidden_states.shape

    def cell(x, h, c, wih, whh, b):
        gates = x @ wih + h @ whh + b
        i = jax.nn.sigmoid(gates[:, 0 * H:1 * H])
        f = jax.nn.sigmoid(gates[:, 1 * H:2 * H])
        g = jnp.tanh(gates[:, 2 * H:3 * H])
        o = jax.nn.sigmoid(gates[:, 3 * H:4 * H])
        cn = f * c + i * g
        hn = o * jnp.tanh(cn)
        return hn, cn

    h0 = jnp.mean(hidden_states, axis=1)
    c0 = jnp.mean(cell_states, axis=1)
    h1 = jnp.mean(jnp.concatenate((global_t_state, hidden_states), axis=1),
                  axis=1)
    c1 = jnp.mean(cell_states, axis=1)

    pres, cs = [], []
    prev = p[:, 0, :]
    for _ in range(seq_length_out):
        x0 = prev
        h0, c0 = cell(x0, h0, c0, params["wih0"], params["whh0"], params["b0"])
        h1, c1 = cell(h0, h1, c1, params["wih1"], params["whh1"], params["b1"])
        pre_f = h1 @ params["wout"] + params["bout"] + x0
        pres.append(pre_f)
        cs.append(c1)
        prev = pre_f
    pre = jnp.stack(pres, axis=1)
    pre_c = jnp.stack(cs, axis=1)
    return pre, pre_c


def make_params(key, input_size, hidden_size):
    """Deterministic synthetic parameters (shapes match nn.LSTMCell / module)."""
    ks = jax.random.split(key, 10)
    H, In = hidden_size, input_size
    bound = 1.0 / jnp.sqrt(H)

    def u(k, shape, b):
        return jax.random.uniform(k, shape, jnp.float32, -b, b)

    # LSTMCell 0: input_size -> hidden_size ; LSTMCell 1: hidden -> hidden.
    # PyTorch stores weight_ih as (4H, in); pre-transpose to (in, 4H).
    wih0 = u(ks[0], (In, 4 * H), bound)
    whh0 = u(ks[1], (H, 4 * H), bound)
    b0 = (u(ks[2], (4 * H,), bound) + u(ks[3], (4 * H,), bound)).reshape(1, 4 * H)
    wih1 = u(ks[4], (H, 4 * H), bound)
    whh1 = u(ks[5], (H, 4 * H), bound)
    b1 = (u(ks[6], (4 * H,), bound) + u(ks[7], (4 * H,), bound)).reshape(1, 4 * H)
    wout = u(ks[8], (H, In), 0.04)
    bout = u(ks[9], (In,), 0.04).reshape(1, In)
    return dict(wih0=wih0, whh0=whh0, b0=b0,
                wih1=wih1, whh1=whh1, b1=b1,
                wout=wout, bout=bout)


if __name__ == "__main__":
    # Small config: input_size=16, hidden_size=32, output_window_size=8,
    # decoder_recurrent_steps=2, batch=2.
    B, In, H = 2, 16, 32
    seq_out = 8
    Th, Tc, Tg, Tp = 5, 5, 3, 4

    key = jax.random.PRNGKey(0)
    k_hs, k_cs, k_gt, k_p, k_par = jax.random.split(key, 5)
    hidden_states = jax.random.normal(k_hs, (B, Th, H), jnp.float32)
    cell_states = jax.random.normal(k_cs, (B, Tc, H), jnp.float32)
    global_t_state = jax.random.normal(k_gt, (B, Tg, H), jnp.float32)
    p = jax.random.normal(k_p, (B, Tp, In), jnp.float32)
    params = make_params(k_par, In, H)

    run = jax.jit(functools.partial(lstm_decoder_pallas,
                                    seq_length_out=seq_out))
    pre, pre_c = run(hidden_states, cell_states, global_t_state, p, params)
    jax.block_until_ready((pre, pre_c))

    pre_ref, pre_c_ref = lstm_decoder_reference(
        hidden_states, cell_states, global_t_state, p, params, seq_out)

    assert pre.shape == (B, seq_out, In)
    assert pre_c.shape == (B, seq_out, H)
    # Tolerance loosened vs the f32 reference because the kernel runs its
    # matmuls in bf16 (f32 accumulation, f32 cell state).
    assert jnp.allclose(pre, pre_ref, atol=5e-2, rtol=5e-2)
    assert jnp.allclose(pre_c, pre_c_ref, atol=5e-2, rtol=5e-2)

    print("KERNEL_OK")
</pallas_src>

<mosaic_0001>
module attributes {stable_mosaic.version = 11 : i64} {
  func.func @lstm_decoder_kernel(%arg0: i32, %arg1: memref<2x32xf32, #tpu.memory_space<vmem>>, %arg2: memref<2x32xf32, #tpu.memory_space<vmem>>, %arg3: memref<2x32xf32, #tpu.memory_space<vmem>>, %arg4: memref<2x16xf32, #tpu.memory_space<vmem>>, %arg5: memref<2x128xf32, #tpu.memory_space<vmem>>, %arg6: memref<32x128xbf16, #tpu.memory_space<vmem>>, %arg7: memref<32x128xbf16, #tpu.memory_space<vmem>>, %arg8: memref<32x128xbf16, #tpu.memory_space<vmem>>, %arg9: memref<1x128xf32, #tpu.memory_space<vmem>>, %arg10: memref<32x128xbf16, #tpu.memory_space<vmem>>, %arg11: memref<1x128xf32, #tpu.memory_space<vmem>>, %arg12: memref<32x16xbf16, #tpu.memory_space<vmem>>, %arg13: memref<1x16xf32, #tpu.memory_space<vmem>>, %arg14: memref<1x128xf32, #tpu.memory_space<vmem>>, %arg15: memref<1x128xf32, #tpu.memory_space<vmem>>, %arg16: memref<2x128xf32, #tpu.memory_space<vmem>>, %arg17: memref<2x256xf32, #tpu.memory_space<vmem>>) attributes {dimension_semantics = [#tpu.dimension_semantics<arbitrary>], iteration_bounds = array<i64: 1>, scalar_prefetch = 0 : i64, scratch_operands = 0 : i64, tpu.core_type = #tpu.core_type<tc>, window_params = [{pipeline_mode = #tpu.pipeline_mode<synchronous>, transform_indices = @transform_0, window_bounds = array<i64: 2, 32>}, {pipeline_mode = #tpu.pipeline_mode<synchronous>, transform_indices = @transform_1, window_bounds = array<i64: 2, 32>}, {pipeline_mode = #tpu.pipeline_mode<synchronous>, transform_indices = @transform_2, window_bounds = array<i64: 2, 32>}, {pipeline_mode = #tpu.pipeline_mode<synchronous>, transform_indices = @transform_3, window_bounds = array<i64: 2, 16>}, {pipeline_mode = #tpu.pipeline_mode<synchronous>, transform_indices = @transform_4, window_bounds = array<i64: 2, 128>}, {pipeline_mode = #tpu.pipeline_mode<synchronous>, transform_indices = @transform_5, window_bounds = array<i64: 32, 128>}, {pipeline_mode = #tpu.pipeline_mode<synchronous>, transform_indices = @transform_6, window_bounds = array<i64: 32, 128>}, {pipeline_mode = #tpu.pipeline_mode<synchronous>, transform_indices = @transform_7, window_bounds = array<i64: 32, 128>}, {pipeline_mode = #tpu.pipeline_mode<synchronous>, transform_indices = @transform_8, window_bounds = array<i64: 1, 128>}, {pipeline_mode = #tpu.pipeline_mode<synchronous>, transform_indices = @transform_9, window_bounds = array<i64: 32, 128>}, {pipeline_mode = #tpu.pipeline_mode<synchronous>, transform_indices = @transform_10, window_bounds = array<i64: 1, 128>}, {pipeline_mode = #tpu.pipeline_mode<synchronous>, transform_indices = @transform_11, window_bounds = array<i64: 32, 16>}, {pipeline_mode = #tpu.pipeline_mode<synchronous>, transform_indices = @transform_12, window_bounds = array<i64: 1, 16>}, {pipeline_mode = #tpu.pipeline_mode<synchronous>, transform_indices = @transform_13, window_bounds = array<i64: 1, 128>}, {pipeline_mode = #tpu.pipeline_mode<synchronous>, transform_indices = @transform_14, window_bounds = array<i64: 1, 128>}, {pipeline_mode = #tpu.pipeline_mode<synchronous>, transform_indices = @transform_15, window_bounds = array<i64: 2, 128>}, {pipeline_mode = #tpu.pipeline_mode<synchronous>, transform_indices = @transform_16, window_bounds = array<i64: 2, 256>}]} {
    %c0 = arith.constant 0 : index
    %c0_0 = arith.constant 0 : index
    %0 = vector.load %arg6[%c0, %c0_0] : memref<32x128xbf16, #tpu.memory_space<vmem>>, vector<32x128xbf16>
    %c0_1 = arith.constant 0 : index
    %c0_2 = arith.constant 0 : index
    %1 = vector.load %arg7[%c0_1, %c0_2] : memref<32x128xbf16, #tpu.memory_space<vmem>>, vector<32x128xbf16>
    %c0_3 = arith.constant 0 : index
    %c0_4 = arith.constant 0 : index
    %2 = vector.load %arg8[%c0_3, %c0_4] : memref<32x128xbf16, #tpu.memory_space<vmem>>, vector<32x128xbf16>
    %c0_5 = arith.constant 0 : index
    %c0_6 = arith.constant 0 : index
    %3 = vector.load %arg10[%c0_5, %c0_6] : memref<32x128xbf16, #tpu.memory_space<vmem>>, vector<32x128xbf16>
    %c0_7 = arith.constant 0 : index
    %c0_8 = arith.constant 0 : index
    %4 = vector.load %arg12[%c0_7, %c0_8] : memref<32x16xbf16, #tpu.memory_space<vmem>>, vector<32x16xbf16>
    %c0_9 = arith.constant 0 : index
    %c0_10 = arith.constant 0 : index
    %5 = vector.load %arg9[%c0_9, %c0_10] : memref<1x128xf32, #tpu.memory_space<vmem>>, vector<1x128xf32>
    %6 = vector.shape_cast %5 : vector<1x128xf32> to vector<1x128xf32>
    %7 = vector.broadcast %6 : vector<1x128xf32> to vector<2x128xf32>
    %c0_11 = arith.constant 0 : index
    %c0_12 = arith.constant 0 : index
    %8 = vector.load %arg11[%c0_11, %c0_12] : memref<1x128xf32, #tpu.memory_space<vmem>>, vector<1x128xf32>
    %9 = vector.shape_cast %8 : vector<1x128xf32> to vector<1x128xf32>
    %10 = vector.broadcast %9 : vector<1x128xf32> to vector<2x128xf32>
    %c0_13 = arith.constant 0 : index
    %c0_14 = arith.constant 0 : index
    %11 = vector.load %arg13[%c0_13, %c0_14] : memref<1x16xf32, #tpu.memory_space<vmem>>, vector<1x16xf32>
    %12 = vector.shape_cast %11 : vector<1x16xf32> to vector<1x16xf32>
    %13 = vector.broadcast %12 : vector<1x16xf32> to vector<2x16xf32>
    %c0_15 = arith.constant 0 : index
    %c0_16 = arith.constant 0 : index
    %14 = vector.load %arg14[%c0_15, %c0_16] : memref<1x128xf32, #tpu.memory_space<vmem>>, vector<1x128xf32>
    %15 = vector.shape_cast %14 : vector<1x128xf32> to vector<1x128xf32>
    %16 = vector.broadcast %15 : vector<1x128xf32> to vector<2x128xf32>
    %c0_17 = arith.constant 0 : index
    %c0_18 = arith.constant 0 : index
    %17 = vector.load %arg15[%c0_17, %c0_18] : memref<1x128xf32, #tpu.memory_space<vmem>>, vector<1x128xf32>
    %18 = vector.shape_cast %17 : vector<1x128xf32> to vector<1x128xf32>
    %19 = vector.broadcast %18 : vector<1x128xf32> to vector<2x128xf32>
    %c0_19 = arith.constant 0 : index
    %c0_20 = arith.constant 0 : index
    %20 = vector.load %arg1[%c0_19, %c0_20] : memref<2x32xf32, #tpu.memory_space<vmem>>, vector<2x32xf32>
    %21 = arith.truncf %20 : vector<2x32xf32> to vector<2x32xbf16>
    %c0_21 = arith.constant 0 : index
    %c0_22 = arith.constant 0 : index
    %22 = vector.load %arg3[%c0_21, %c0_22] : memref<2x32xf32, #tpu.memory_space<vmem>>, vector<2x32xf32>
    %23 = arith.truncf %22 : vector<2x32xf32> to vector<2x32xbf16>
    %c0_23 = arith.constant 0 : index
    %c0_24 = arith.constant 0 : index
    %24 = vector.load %arg2[%c0_23, %c0_24] : memref<2x32xf32, #tpu.memory_space<vmem>>, vector<2x32xf32>
    %c0_25 = arith.constant 0 : index
    %c0_26 = arith.constant 0 : index
    %25 = vector.load %arg2[%c0_25, %c0_26] : memref<2x32xf32, #tpu.memory_space<vmem>>, vector<2x32xf32>
    %c0_27 = arith.constant 0 : index
    %c0_28 = arith.constant 0 : index
    %26 = vector.load %arg5[%c0_27, %c0_28] : memref<2x128xf32, #tpu.memory_space<vmem>>, vector<2x128xf32>
    %cst = arith.constant dense<0.000000e+00> : vector<2x128xf32>
    %27 = tpu.matmul %21, %0, %cst {dimension_numbers = #tpu.dot_dimension_numbers<[1], [0], [0], [1], [0, 0, 1, 1], [], []>} : vector<2x32xbf16>, vector<32x128xbf16>, vector<2x128xf32> -> vector<2x128xf32>
    %28 = arith.addf %26, %27 : vector<2x128xf32>
    %29 = arith.negf %28 : vector<2x128xf32>
    %30 = math.exp %29 : vector<2x128xf32>
    %cst_29 = arith.constant 1.000000e+00 : f32
    %31 = vector.broadcast %cst_29 : f32 to vector<2x128xf32>
    %32 = arith.addf %31, %30 : vector<2x128xf32>
    %33 = arith.divf %31, %32 : vector<2x128xf32>
    %34 = arith.mulf %33, %16 : vector<2x128xf32>
    %35 = arith.addf %34, %19 : vector<2x128xf32>
    %36 = vector.extract_strided_slice %35 {offsets = [0, 0], sizes = [2, 32], strides = [1, 1]} : vector<2x128xf32> to vector<2x32xf32>
    %37 = vector.extract_strided_slice %35 {offsets = [0, 32], sizes = [2, 32], strides = [1, 1]} : vector<2x128xf32> to vector<2x32xf32>
    %38 = vector.extract_strided_slice %35 {offsets = [0, 64], sizes = [2, 32], strides = [1, 1]} : vector<2x128xf32> to vector<2x32xf32>
    %39 = vector.extract_strided_slice %35 {offsets = [0, 96], sizes = [2, 32], strides = [1, 1]} : vector<2x128xf32> to vector<2x32xf32>
    %40 = arith.mulf %37, %24 : vector<2x32xf32>
    %41 = arith.mulf %36, %38 : vector<2x32xf32>
    %42 = arith.addf %40, %41 : vector<2x32xf32>
    %43 = math.tanh %42 : vector<2x32xf32>
    %44 = arith.mulf %39, %43 : vector<2x32xf32>
    %45 = arith.truncf %44 : vector<2x32xf32> to vector<2x32xbf16>
    %cst_30 = arith.constant dense<0.000000e+00> : vector<2x128xf32>
    %46 = tpu.matmul %45, %1, %cst_30 {dimension_numbers = #tpu.dot_dimension_numbers<[1], [0], [0], [1], [0, 0, 1, 1], [], []>} : vector<2x32xbf16>, vector<32x128xbf16>, vector<2x128xf32> -> vector<2x128xf32>
    %cst_31 = arith.constant dense<0.000000e+00> : vector<2x128xf32>
    %47 = tpu.matmul %23, %2, %cst_31 {dimension_numbers = #tpu.dot_dimension_numbers<[1], [0], [0], [1], [0, 0, 1, 1], [], []>} : vector<2x32xbf16>, vector<32x128xbf16>, vector<2x128xf32> -> vector<2x128xf32>
    %48 = arith.addf %46, %47 : vector<2x128xf32>
    %49 = arith.addf %48, %7 : vector<2x128xf32>
    %50 = arith.negf %49 : vector<2x128xf32>
    %51 = math.exp %50 : vector<2x128xf32>
    %cst_32 = arith.constant 1.000000e+00 : f32
    %52 = vector.broadcast %cst_32 : f32 to vector<2x128xf32>
    %53 = arith.addf %52, %51 : vector<2x128xf32>
    %54 = arith.divf %52, %53 : vector<2x128xf32>
    %55 = arith.mulf %54, %16 : vector<2x128xf32>
    %56 = arith.addf %55, %19 : vector<2x128xf32>
    %57 = vector.extract_strided_slice %56 {offsets = [0, 0], sizes = [2, 32], strides = [1, 1]} : vector<2x128xf32> to vector<2x32xf32>
    %58 = vector.extract_strided_slice %56 {offsets = [0, 32], sizes = [2, 32], strides = [1, 1]} : vector<2x128xf32> to vector<2x32xf32>
    %59 = vector.extract_strided_slice %56 {offsets = [0, 64], sizes = [2, 32], strides = [1, 1]} : vector<2x128xf32> to vector<2x32xf32>
    %60 = vector.extract_strided_slice %56 {offsets = [0, 96], sizes = [2, 32], strides = [1, 1]} : vector<2x128xf32> to vector<2x32xf32>
    %61 = arith.mulf %58, %25 : vector<2x32xf32>
    %62 = arith.mulf %57, %59 : vector<2x32xf32>
    %63 = arith.addf %61, %62 : vector<2x32xf32>
    %64 = math.tanh %63 : vector<2x32xf32>
    %65 = arith.mulf %60, %64 : vector<2x32xf32>
    %66 = arith.truncf %65 : vector<2x32xf32> to vector<2x32xbf16>
    %cst_33 = arith.constant dense<0.000000e+00> : vector<2x128xf32>
    %67 = tpu.matmul %66, %3, %cst_33 {dimension_numbers = #tpu.dot_dimension_numbers<[1], [0], [0], [1], [0, 0, 1, 1], [], []>} : vector<2x32xbf16>, vector<32x128xbf16>, vector<2x128xf32> -> vector<2x128xf32>
    %68 = arith.addf %26, %67 : vector<2x128xf32>
    %69 = arith.addf %68, %10 : vector<2x128xf32>
    %cst_34 = arith.constant dense<0.000000e+00> : vector<2x128xf32>
    %70 = tpu.matmul %45, %0, %cst_34 {dimension_numbers = #tpu.dot_dimension_numbers<[1], [0], [0], [1], [0, 0, 1, 1], [], []>} : vector<2x32xbf16>, vector<32x128xbf16>, vector<2x128xf32> -> vector<2x128xf32>
    %71 = arith.addf %69, %70 : vector<2x128xf32>
    %72 = arith.negf %71 : vector<2x128xf32>
    %73 = math.exp %72 : vector<2x128xf32>
    %cst_35 = arith.constant 1.000000e+00 : f32
    %74 = vector.broadcast %cst_35 : f32 to vector<2x128xf32>
    %75 = arith.addf %74, %73 : vector<2x128xf32>
    %76 = arith.divf %74, %75 : vector<2x128xf32>
    %77 = arith.mulf %76, %16 : vector<2x128xf32>
    %78 = arith.addf %77, %19 : vector<2x128xf32>
    %79 = vector.extract_strided_slice %78 {offsets = [0, 0], sizes = [2, 32], strides = [1, 1]} : vector<2x128xf32> to vector<2x32xf32>
    %80 = vector.extract_strided_slice %78 {offsets = [0, 32], sizes = [2, 32], strides = [1, 1]} : vector<2x128xf32> to vector<2x32xf32>
    %81 = vector.extract_strided_slice %78 {offsets = [0, 64], sizes = [2, 32], strides = [1, 1]} : vector<2x128xf32> to vector<2x32xf32>
    %82 = vector.extract_strided_slice %78 {offsets = [0, 96], sizes = [2, 32], strides = [1, 1]} : vector<2x128xf32> to vector<2x32xf32>
    %83 = arith.mulf %80, %42 : vector<2x32xf32>
    %84 = arith.mulf %79, %81 : vector<2x32xf32>
    %85 = arith.addf %83, %84 : vector<2x32xf32>
    %86 = math.tanh %85 : vector<2x32xf32>
    %87 = arith.mulf %82, %86 : vector<2x32xf32>
    %88 = arith.truncf %87 : vector<2x32xf32> to vector<2x32xbf16>
    %cst_36 = arith.constant dense<0.000000e+00> : vector<2x128xf32>
    %89 = tpu.matmul %88, %1, %cst_36 {dimension_numbers = #tpu.dot_dimension_numbers<[1], [0], [0], [1], [0, 0, 1, 1], [], []>} : vector<2x32xbf16>, vector<32x128xbf16>, vector<2x128xf32> -> vector<2x128xf32>
    %cst_37 = arith.constant dense<0.000000e+00> : vector<2x128xf32>
    %90 = tpu.matmul %66, %2, %cst_37 {dimension_numbers = #tpu.dot_dimension_numbers<[1], [0], [0], [1], [0, 0, 1, 1], [], []>} : vector<2x32xbf16>, vector<32x128xbf16>, vector<2x128xf32> -> vector<2x128xf32>
    %91 = arith.addf %89, %90 : vector<2x128xf32>
    %92 = arith.addf %91, %7 : vector<2x128xf32>
    %93 = arith.negf %92 : vector<2x128xf32>
    %94 = math.exp %93 : vector<2x128xf32>
    %cst_38 = arith.constant 1.000000e+00 : f32
    %95 = vector.broadcast %cst_38 : f32 to vector<2x128xf32>
    %96 = arith.addf %95, %94 : vector<2x128xf32>
    %97 = arith.divf %95, %96 : vector<2x128xf32>
    %98 = arith.mulf %97, %16 : vector<2x128xf32>
    %99 = arith.addf %98, %19 : vector<2x128xf32>
    %100 = vector.extract_strided_slice %99 {offsets = [0, 0], sizes = [2, 32], strides = [1, 1]} : vector<2x128xf32> to vector<2x32xf32>
    %101 = vector.extract_strided_slice %99 {offsets = [0, 32], sizes = [2, 32], strides = [1, 1]} : vector<2x128xf32> to vector<2x32xf32>
    %102 = vector.extract_strided_slice %99 {offsets = [0, 64], sizes = [2, 32], strides = [1, 1]} : vector<2x128xf32> to vector<2x32xf32>
    %103 = vector.extract_strided_slice %99 {offsets = [0, 96], sizes = [2, 32], strides = [1, 1]} : vector<2x128xf32> to vector<2x32xf32>
    %104 = arith.mulf %101, %63 : vector<2x32xf32>
    %105 = arith.mulf %100, %102 : vector<2x32xf32>
    %106 = arith.addf %104, %105 : vector<2x32xf32>
    %107 = math.tanh %106 : vector<2x32xf32>
    %108 = arith.mulf %103, %107 : vector<2x32xf32>
    %109 = arith.truncf %108 : vector<2x32xf32> to vector<2x32xbf16>
    %cst_39 = arith.constant dense<0.000000e+00> : vector<2x128xf32>
    %110 = tpu.matmul %109, %3, %cst_39 {dimension_numbers = #tpu.dot_dimension_numbers<[1], [0], [0], [1], [0, 0, 1, 1], [], []>} : vector<2x32xbf16>, vector<32x128xbf16>, vector<2x128xf32> -> vector<2x128xf32>
    %111 = arith.addf %69, %110 : vector<2x128xf32>
    %112 = arith.addf %111, %10 : vector<2x128xf32>
    %cst_40 = arith.constant dense<0.000000e+00> : vector<2x128xf32>
    %113 = tpu.matmul %88, %0, %cst_40 {dimension_numbers = #tpu.dot_dimension_numbers<[1], [0], [0], [1], [0, 0, 1, 1], [], []>} : vector<2x32xbf16>, vector<32x128xbf16>, vector<2x128xf32> -> vector<2x128xf32>
    %114 = arith.addf %112, %113 : vector<2x128xf32>
    %115 = arith.negf %114 : vector<2x128xf32>
    %116 = math.exp %115 : vector<2x128xf32>
    %cst_41 = arith.constant 1.000000e+00 : f32
    %117 = vector.broadcast %cst_41 : f32 to vector<2x128xf32>
    %118 = arith.addf %117, %116 : vector<2x128xf32>
    %119 = arith.divf %117, %118 : vector<2x128xf32>
    %120 = arith.mulf %119, %16 : vector<2x128xf32>
    %121 = arith.addf %120, %19 : vector<2x128xf32>
    %122 = vector.extract_strided_slice %121 {offsets = [0, 0], sizes = [2, 32], strides = [1, 1]} : vector<2x128xf32> to vector<2x32xf32>
    %123 = vector.extract_strided_slice %121 {offsets = [0, 32], sizes = [2, 32], strides = [1, 1]} : vector<2x128xf32> to vector<2x32xf32>
    %124 = vector.extract_strided_slice %121 {offsets = [0, 64], sizes = [2, 32], strides = [1, 1]} : vector<2x128xf32> to vector<2x32xf32>
    %125 = vector.extract_strided_slice %121 {offsets = [0, 96], sizes = [2, 32], strides = [1, 1]} : vector<2x128xf32> to vector<2x32xf32>
    %126 = arith.mulf %123, %85 : vector<2x32xf32>
    %127 = arith.mulf %122, %124 : vector<2x32xf32>
    %128 = arith.addf %126, %127 : vector<2x32xf32>
    %129 = math.tanh %128 : vector<2x32xf32>
    %130 = arith.mulf %125, %129 : vector<2x32xf32>
    %131 = arith.truncf %130 : vector<2x32xf32> to vector<2x32xbf16>
    %cst_42 = arith.constant dense<0.000000e+00> : vector<2x128xf32>
    %132 = tpu.matmul %131, %1, %cst_42 {dimension_numbers = #tpu.dot_dimension_numbers<[1], [0], [0], [1], [0, 0, 1, 1], [], []>} : vector<2x32xbf16>, vector<32x128xbf16>, vector<2x128xf32> -> vector<2x128xf32>
    %cst_43 = arith.constant dense<0.000000e+00> : vector<2x128xf32>
    %133 = tpu.matmul %109, %2, %cst_43 {dimension_numbers = #tpu.dot_dimension_numbers<[1], [0], [0], [1], [0, 0, 1, 1], [], []>} : vector<2x32xbf16>, vector<32x128xbf16>, vector<2x128xf32> -> vector<2x128xf32>
    %134 = arith.addf %132, %133 : vector<2x128xf32>
    %135 = arith.addf %134, %7 : vector<2x128xf32>
    %136 = arith.negf %135 : vector<2x128xf32>
    %137 = math.exp %136 : vector<2x128xf32>
    %cst_44 = arith.constant 1.000000e+00 : f32
    %138 = vector.broadcast %cst_44 : f32 to vector<2x128xf32>
    %139 = arith.addf %138, %137 : vector<2x128xf32>
    %140 = arith.divf %138, %139 : vector<2x128xf32>
    %141 = arith.mulf %140, %16 : vector<2x128xf32>
    %142 = arith.addf %141, %19 : vector<2x128xf32>
    %143 = vector.extract_strided_slice %142 {offsets = [0, 0], sizes = [2, 32], strides = [1, 1]} : vector<2x128xf32> to vector<2x32xf32>
    %144 = vector.extract_strided_slice %142 {offsets = [0, 32], sizes = [2, 32], strides = [1, 1]} : vector<2x128xf32> to vector<2x32xf32>
    %145 = vector.extract_strided_slice %142 {offsets = [0, 64], sizes = [2, 32], strides = [1, 1]} : vector<2x128xf32> to vector<2x32xf32>
    %146 = vector.extract_strided_slice %142 {offsets = [0, 96], sizes = [2, 32], strides = [1, 1]} : vector<2x128xf32> to vector<2x32xf32>
    %147 = arith.mulf %144, %106 : vector<2x32xf32>
    %148 = arith.mulf %143, %145 : vector<2x32xf32>
    %149 = arith.addf %147, %148 : vector<2x32xf32>
    %150 = math.tanh %149 : vector<2x32xf32>
    %151 = arith.mulf %146, %150 : vector<2x32xf32>
    %152 = arith.truncf %151 : vector<2x32xf32> to vector<2x32xbf16>
    %cst_45 = arith.constant dense<0.000000e+00> : vector<2x128xf32>
    %153 = tpu.matmul %152, %3, %cst_45 {dimension_numbers = #tpu.dot_dimension_numbers<[1], [0], [0], [1], [0, 0, 1, 1], [], []>} : vector<2x32xbf16>, vector<32x128xbf16>, vector<2x128xf32> -> vector<2x128xf32>
    %154 = arith.addf %112, %153 : vector<2x128xf32>
    %155 = arith.addf %154, %10 : vector<2x128xf32>
    %cst_46 = arith.constant dense<0.000000e+00> : vector<2x128xf32>
    %156 = tpu.matmul %131, %0, %cst_46 {dimension_numbers = #tpu.dot_dimension_numbers<[1], [0], [0], [1], [0, 0, 1, 1], [], []>} : vector<2x32xbf16>, vector<32x128xbf16>, vector<2x128xf32> -> vector<2x128xf32>
    %157 = arith.addf %155, %156 : vector<2x128xf32>
    %158 = arith.negf %157 : vector<2x128xf32>
    %159 = math.exp %158 : vector<2x128xf32>
    %cst_47 = arith.constant 1.000000e+00 : f32
    %160 = vector.broadcast %cst_47 : f32 to vector<2x128xf32>
    %161 = arith.addf %160, %159 : vector<2x128xf32>
    %162 = arith.divf %160, %161 : vector<2x128xf32>
    %163 = arith.mulf %162, %16 : vector<2x128xf32>
    %164 = arith.addf %163, %19 : vector<2x128xf32>
    %165 = vector.extract_strided_slice %164 {offsets = [0, 0], sizes = [2, 32], strides = [1, 1]} : vector<2x128xf32> to vector<2x32xf32>
    %166 = vector.extract_strided_slice %164 {offsets = [0, 32], sizes = [2, 32], strides = [1, 1]} : vector<2x128xf32> to vector<2x32xf32>
    %167 = vector.extract_strided_slice %164 {offsets = [0, 64], sizes = [2, 32], strides = [1, 1]} : vector<2x128xf32> to vector<2x32xf32>
    %168 = vector.extract_strided_slice %164 {offsets = [0, 96], sizes = [2, 32], strides = [1, 1]} : vector<2x128xf32> to vector<2x32xf32>
    %169 = arith.mulf %166, %128 : vector<2x32xf32>
    %170 = arith.mulf %165, %167 : vector<2x32xf32>
    %171 = arith.addf %169, %170 : vector<2x32xf32>
    %172 = math.tanh %171 : vector<2x32xf32>
    %173 = arith.mulf %168, %172 : vector<2x32xf32>
    %174 = arith.truncf %173 : vector<2x32xf32> to vector<2x32xbf16>
    %cst_48 = arith.constant dense<0.000000e+00> : vector<2x128xf32>
    %175 = tpu.matmul %174, %1, %cst_48 {dimension_numbers = #tpu.dot_dimension_numbers<[1], [0], [0], [1], [0, 0, 1, 1], [], []>} : vector<2x32xbf16>, vector<32x128xbf16>, vector<2x128xf32> -> vector<2x128xf32>
    %cst_49 = arith.constant dense<0.000000e+00> : vector<2x128xf32>
    %176 = tpu.matmul %152, %2, %cst_49 {dimension_numbers = #tpu.dot_dimension_numbers<[1], [0], [0], [1], [0, 0, 1, 1], [], []>} : vector<2x32xbf16>, vector<32x128xbf16>, vector<2x128xf32> -> vector<2x128xf32>
    %177 = arith.addf %175, %176 : vector<2x128xf32>
    %178 = arith.addf %177, %7 : vector<2x128xf32>
    %179 = arith.negf %178 : vector<2x128xf32>
    %180 = math.exp %179 : vector<2x128xf32>
    %cst_50 = arith.constant 1.000000e+00 : f32
    %181 = vector.broadcast %cst_50 : f32 to vector<2x128xf32>
    %182 = arith.addf %181, %180 : vector<2x128xf32>
    %183 = arith.divf %181, %182 : vector<2x128xf32>
    %184 = arith.mulf %183, %16 : vector<2x128xf32>
    %185 = arith.addf %184, %19 : vector<2x128xf32>
    %186 = vector.extract_strided_slice %185 {offsets = [0, 0], sizes = [2, 32], strides = [1, 1]} : vector<2x128xf32> to vector<2x32xf32>
    %187 = vector.extract_strided_slice %185 {offsets = [0, 32], sizes = [2, 32], strides = [1, 1]} : vector<2x128xf32> to vector<2x32xf32>
    %188 = vector.extract_strided_slice %185 {offsets = [0, 64], sizes = [2, 32], strides = [1, 1]} : vector<2x128xf32> to vector<2x32xf32>
    %189 = vector.extract_strided_slice %185 {offsets = [0, 96], sizes = [2, 32], strides = [1, 1]} : vector<2x128xf32> to vector<2x32xf32>
    %190 = arith.mulf %187, %149 : vector<2x32xf32>
    %191 = arith.mulf %186, %188 : vector<2x32xf32>
    %192 = arith.addf %190, %191 : vector<2x32xf32>
    %193 = math.tanh %192 : vector<2x32xf32>
    %194 = arith.mulf %189, %193 : vector<2x32xf32>
    %195 = arith.truncf %194 : vector<2x32xf32> to vector<2x32xbf16>
    %cst_51 = arith.constant dense<0.000000e+00> : vector<2x128xf32>
    %196 = tpu.matmul %195, %3, %cst_51 {dimension_numbers = #tpu.dot_dimension_numbers<[1], [0], [0], [1], [0, 0, 1, 1], [], []>} : vector<2x32xbf16>, vector<32x128xbf16>, vector<2x128xf32> -> vector<2x128xf32>
    %197 = arith.addf %155, %196 : vector<2x128xf32>
    %198 = arith.addf %197, %10 : vector<2x128xf32>
    %cst_52 = arith.constant dense<0.000000e+00> : vector<2x128xf32>
    %199 = tpu.matmul %174, %0, %cst_52 {dimension_numbers = #tpu.dot_dimension_numbers<[1], [0], [0], [1], [0, 0, 1, 1], [], []>} : vector<2x32xbf16>, vector<32x128xbf16>, vector<2x128xf32> -> vector<2x128xf32>
    %200 = arith.addf %198, %199 : vector<2x128xf32>
    %201 = arith.negf %200 : vector<2x128xf32>
    %202 = math.exp %201 : vector<2x128xf32>
    %cst_53 = arith.constant 1.000000e+00 : f32
    %203 = vector.broadcast %cst_53 : f32 to vector<2x128xf32>
    %204 = arith.addf %203, %202 : vector<2x128xf32>
    %205 = arith.divf %203, %204 : vector<2x128xf32>
    %206 = arith.mulf %205, %16 : vector<2x128xf32>
    %207 = arith.addf %206, %19 : vector<2x128xf32>
    %208 = vector.extract_strided_slice %207 {offsets = [0, 0], sizes = [2, 32], strides = [1, 1]} : vector<2x128xf32> to vector<2x32xf32>
    %209 = vector.extract_strided_slice %207 {offsets = [0, 32], sizes = [2, 32], strides = [1, 1]} : vector<2x128xf32> to vector<2x32xf32>
    %210 = vector.extract_strided_slice %207 {offsets = [0, 64], sizes = [2, 32], strides = [1, 1]} : vector<2x128xf32> to vector<2x32xf32>
    %211 = vector.extract_strided_slice %207 {offsets = [0, 96], sizes = [2, 32], strides = [1, 1]} : vector<2x128xf32> to vector<2x32xf32>
    %212 = arith.mulf %209, %171 : vector<2x32xf32>
    %213 = arith.mulf %208, %210 : vector<2x32xf32>
    %214 = arith.addf %212, %213 : vector<2x32xf32>
    %215 = math.tanh %214 : vector<2x32xf32>
    %216 = arith.mulf %211, %215 : vector<2x32xf32>
    %217 = arith.truncf %216 : vector<2x32xf32> to vector<2x32xbf16>
    %cst_54 = arith.constant dense<0.000000e+00> : vector<2x128xf32>
    %218 = tpu.matmul %217, %1, %cst_54 {dimension_numbers = #tpu.dot_dimension_numbers<[1], [0], [0], [1], [0, 0, 1, 1], [], []>} : vector<2x32xbf16>, vector<32x128xbf16>, vector<2x128xf32> -> vector<2x128xf32>
    %cst_55 = arith.constant dense<0.000000e+00> : vector<2x128xf32>
    %219 = tpu.matmul %195, %2, %cst_55 {dimension_numbers = #tpu.dot_dimension_numbers<[1], [0], [0], [1], [0, 0, 1, 1], [], []>} : vector<2x32xbf16>, vector<32x128xbf16>, vector<2x128xf32> -> vector<2x128xf32>
    %220 = arith.addf %218, %219 : vector<2x128xf32>
    %221 = arith.addf %220, %7 : vector<2x128xf32>
    %222 = arith.negf %221 : vector<2x128xf32>
    %223 = math.exp %222 : vector<2x128xf32>
    %cst_56 = arith.constant 1.000000e+00 : f32
    %224 = vector.broadcast %cst_56 : f32 to vector<2x128xf32>
    %225 = arith.addf %224, %223 : vector<2x128xf32>
    %226 = arith.divf %224, %225 : vector<2x128xf32>
    %227 = arith.mulf %226, %16 : vector<2x128xf32>
    %228 = arith.addf %227, %19 : vector<2x128xf32>
    %229 = vector.extract_strided_slice %228 {offsets = [0, 0], sizes = [2, 32], strides = [1, 1]} : vector<2x128xf32> to vector<2x32xf32>
    %230 = vector.extract_strided_slice %228 {offsets = [0, 32], sizes = [2, 32], strides = [1, 1]} : vector<2x128xf32> to vector<2x32xf32>
    %231 = vector.extract_strided_slice %228 {offsets = [0, 64], sizes = [2, 32], strides = [1, 1]} : vector<2x128xf32> to vector<2x32xf32>
    %232 = vector.extract_strided_slice %228 {offsets = [0, 96], sizes = [2, 32], strides = [1, 1]} : vector<2x128xf32> to vector<2x32xf32>
    %233 = arith.mulf %230, %192 : vector<2x32xf32>
    %234 = arith.mulf %229, %231 : vector<2x32xf32>
    %235 = arith.addf %233, %234 : vector<2x32xf32>
    %236 = math.tanh %235 : vector<2x32xf32>
    %237 = arith.mulf %232, %236 : vector<2x32xf32>
    %238 = arith.truncf %237 : vector<2x32xf32> to vector<2x32xbf16>
    %cst_57 = arith.constant dense<0.000000e+00> : vector<2x128xf32>
    %239 = tpu.matmul %238, %3, %cst_57 {dimension_numbers = #tpu.dot_dimension_numbers<[1], [0], [0], [1], [0, 0, 1, 1], [], []>} : vector<2x32xbf16>, vector<32x128xbf16>, vector<2x128xf32> -> vector<2x128xf32>
    %240 = arith.addf %198, %239 : vector<2x128xf32>
    %241 = arith.addf %240, %10 : vector<2x128xf32>
    %cst_58 = arith.constant dense<0.000000e+00> : vector<2x128xf32>
    %242 = tpu.matmul %217, %0, %cst_58 {dimension_numbers = #tpu.dot_dimension_numbers<[1], [0], [0], [1], [0, 0, 1, 1], [], []>} : vector<2x32xbf16>, vector<32x128xbf16>, vector<2x128xf32> -> vector<2x128xf32>
    %243 = arith.addf %241, %242 : vector<2x128xf32>
    %244 = arith.negf %243 : vector<2x128xf32>
    %245 = math.exp %244 : vector<2x128xf32>
    %cst_59 = arith.constant 1.000000e+00 : f32
    %246 = vector.broadcast %cst_59 : f32 to vector<2x128xf32>
    %247 = arith.addf %246, %245 : vector<2x128xf32>
    %248 = arith.divf %246, %247 : vector<2x128xf32>
    %249 = arith.mulf %248, %16 : vector<2x128xf32>
    %250 = arith.addf %249, %19 : vector<2x128xf32>
    %251 = vector.extract_strided_slice %250 {offsets = [0, 0], sizes = [2, 32], strides = [1, 1]} : vector<2x128xf32> to vector<2x32xf32>
    %252 = vector.extract_strided_slice %250 {offsets = [0, 32], sizes = [2, 32], strides = [1, 1]} : vector<2x128xf32> to vector<2x32xf32>
    %253 = vector.extract_strided_slice %250 {offsets = [0, 64], sizes = [2, 32], strides = [1, 1]} : vector<2x128xf32> to vector<2x32xf32>
    %254 = vector.extract_strided_slice %250 {offsets = [0, 96], sizes = [2, 32], strides = [1, 1]} : vector<2x128xf32> to vector<2x32xf32>
    %255 = arith.mulf %252, %214 : vector<2x32xf32>
    %256 = arith.mulf %251, %253 : vector<2x32xf32>
    %257 = arith.addf %255, %256 : vector<2x32xf32>
    %258 = math.tanh %257 : vector<2x32xf32>
    %259 = arith.mulf %254, %258 : vector<2x32xf32>
    %260 = arith.truncf %259 : vector<2x32xf32> to vector<2x32xbf16>
    %cst_60 = arith.constant dense<0.000000e+00> : vector<2x128xf32>
    %261 = tpu.matmul %260, %1, %cst_60 {dimension_numbers = #tpu.dot_dimension_numbers<[1], [0], [0], [1], [0, 0, 1, 1], [], []>} : vector<2x32xbf16>, vector<32x128xbf16>, vector<2x128xf32> -> vector<2x128xf32>
    %cst_61 = arith.constant dense<0.000000e+00> : vector<2x128xf32>
    %262 = tpu.matmul %238, %2, %cst_61 {dimension_numbers = #tpu.dot_dimension_numbers<[1], [0], [0], [1], [0, 0, 1, 1], [], []>} : vector<2x32xbf16>, vector<32x128xbf16>, vector<2x128xf32> -> vector<2x128xf32>
    %263 = arith.addf %261, %262 : vector<2x128xf32>
    %264 = arith.addf %263, %7 : vector<2x128xf32>
    %265 = arith.negf %264 : vector<2x128xf32>
    %266 = math.exp %265 : vector<2x128xf32>
    %cst_62 = arith.constant 1.000000e+00 : f32
    %267 = vector.broadcast %cst_62 : f32 to vector<2x128xf32>
    %268 = arith.addf %267, %266 : vector<2x128xf32>
    %269 = arith.divf %267, %268 : vector<2x128xf32>
    %270 = arith.mulf %269, %16 : vector<2x128xf32>
    %271 = arith.addf %270, %19 : vector<2x128xf32>
    %272 = vector.extract_strided_slice %271 {offsets = [0, 0], sizes = [2, 32], strides = [1, 1]} : vector<2x128xf32> to vector<2x32xf32>
    %273 = vector.extract_strided_slice %271 {offsets = [0, 32], sizes = [2, 32], strides = [1, 1]} : vector<2x128xf32> to vector<2x32xf32>
    %274 = vector.extract_strided_slice %271 {offsets = [0, 64], sizes = [2, 32], strides = [1, 1]} : vector<2x128xf32> to vector<2x32xf32>
    %275 = vector.extract_strided_slice %271 {offsets = [0, 96], sizes = [2, 32], strides = [1, 1]} : vector<2x128xf32> to vector<2x32xf32>
    %276 = arith.mulf %273, %235 : vector<2x32xf32>
    %277 = arith.mulf %272, %274 : vector<2x32xf32>
    %278 = arith.addf %276, %277 : vector<2x32xf32>
    %279 = math.tanh %278 : vector<2x32xf32>
    %280 = arith.mulf %275, %279 : vector<2x32xf32>
    %281 = arith.truncf %280 : vector<2x32xf32> to vector<2x32xbf16>
    %cst_63 = arith.constant dense<0.000000e+00> : vector<2x128xf32>
    %282 = tpu.matmul %281, %3, %cst_63 {dimension_numbers = #tpu.dot_dimension_numbers<[1], [0], [0], [1], [0, 0, 1, 1], [], []>} : vector<2x32xbf16>, vector<32x128xbf16>, vector<2x128xf32> -> vector<2x128xf32>
    %283 = arith.addf %241, %282 : vector<2x128xf32>
    %284 = arith.addf %283, %10 : vector<2x128xf32>
    %cst_64 = arith.constant dense<0.000000e+00> : vector<2x128xf32>
    %285 = tpu.matmul %260, %0, %cst_64 {dimension_numbers = #tpu.dot_dimension_numbers<[1], [0], [0], [1], [0, 0, 1, 1], [], []>} : vector<2x32xbf16>, vector<32x128xbf16>, vector<2x128xf32> -> vector<2x128xf32>
    %286 = arith.addf %284, %285 : vector<2x128xf32>
    %287 = arith.negf %286 : vector<2x128xf32>
    %288 = math.exp %287 : vector<2x128xf32>
    %cst_65 = arith.constant 1.000000e+00 : f32
    %289 = vector.broadcast %cst_65 : f32 to vector<2x128xf32>
    %290 = arith.addf %289, %288 : vector<2x128xf32>
    %291 = arith.divf %289, %290 : vector<2x128xf32>
    %292 = arith.mulf %291, %16 : vector<2x128xf32>
    %293 = arith.addf %292, %19 : vector<2x128xf32>
    %294 = vector.extract_strided_slice %293 {offsets = [0, 0], sizes = [2, 32], strides = [1, 1]} : vector<2x128xf32> to vector<2x32xf32>
    %295 = vector.extract_strided_slice %293 {offsets = [0, 32], sizes = [2, 32], strides = [1, 1]} : vector<2x128xf32> to vector<2x32xf32>
    %296 = vector.extract_strided_slice %293 {offsets = [0, 64], sizes = [2, 32], strides = [1, 1]} : vector<2x128xf32> to vector<2x32xf32>
    %297 = vector.extract_strided_slice %293 {offsets = [0, 96], sizes = [2, 32], strides = [1, 1]} : vector<2x128xf32> to vector<2x32xf32>
    %298 = arith.mulf %295, %257 : vector<2x32xf32>
    %299 = arith.mulf %294, %296 : vector<2x32xf32>
    %300 = arith.addf %298, %299 : vector<2x32xf32>
    %301 = math.tanh %300 : vector<2x32xf32>
    %302 = arith.mulf %297, %301 : vector<2x32xf32>
    %303 = arith.truncf %302 : vector<2x32xf32> to vector<2x32xbf16>
    %cst_66 = arith.constant dense<0.000000e+00> : vector<2x128xf32>
    %304 = tpu.matmul %303, %1, %cst_66 {dimension_numbers = #tpu.dot_dimension_numbers<[1], [0], [0], [1], [0, 0, 1, 1], [], []>} : vector<2x32xbf16>, vector<32x128xbf16>, vector<2x128xf32> -> vector<2x128xf32>
    %cst_67 = arith.constant dense<0.000000e+00> : vector<2x128xf32>
    %305 = tpu.matmul %281, %2, %cst_67 {dimension_numbers = #tpu.dot_dimension_numbers<[1], [0], [0], [1], [0, 0, 1, 1], [], []>} : vector<2x32xbf16>, vector<32x128xbf16>, vector<2x128xf32> -> vector<2x128xf32>
    %306 = arith.addf %304, %305 : vector<2x128xf32>
    %307 = arith.addf %306, %7 : vector<2x128xf32>
    %308 = arith.negf %307 : vector<2x128xf32>
    %309 = math.exp %308 : vector<2x128xf32>
    %cst_68 = arith.constant 1.000000e+00 : f32
    %310 = vector.broadcast %cst_68 : f32 to vector<2x128xf32>
    %311 = arith.addf %310, %309 : vector<2x128xf32>
    %312 = arith.divf %310, %311 : vector<2x128xf32>
    %313 = arith.mulf %312, %16 : vector<2x128xf32>
    %314 = arith.addf %313, %19 : vector<2x128xf32>
    %315 = vector.extract_strided_slice %314 {offsets = [0, 0], sizes = [2, 32], strides = [1, 1]} : vector<2x128xf32> to vector<2x32xf32>
    %316 = vector.extract_strided_slice %314 {offsets = [0, 32], sizes = [2, 32], strides = [1, 1]} : vector<2x128xf32> to vector<2x32xf32>
    %317 = vector.extract_strided_slice %314 {offsets = [0, 64], sizes = [2, 32], strides = [1, 1]} : vector<2x128xf32> to vector<2x32xf32>
    %318 = vector.extract_strided_slice %314 {offsets = [0, 96], sizes = [2, 32], strides = [1, 1]} : vector<2x128xf32> to vector<2x32xf32>
    %319 = arith.mulf %316, %278 : vector<2x32xf32>
    %320 = arith.mulf %315, %317 : vector<2x32xf32>
    %321 = arith.addf %319, %320 : vector<2x32xf32>
    %322 = math.tanh %321 : vector<2x32xf32>
    %323 = arith.mulf %318, %322 : vector<2x32xf32>
    %324 = arith.truncf %323 : vector<2x32xf32> to vector<2x32xbf16>
    %cst_69 = arith.constant dense<0.000000e+00> : vector<2x128xf32>
    %325 = tpu.matmul %324, %3, %cst_69 {dimension_numbers = #tpu.dot_dimension_numbers<[1], [0], [0], [1], [0, 0, 1, 1], [], []>} : vector<2x32xbf16>, vector<32x128xbf16>, vector<2x128xf32> -> vector<2x128xf32>
    %326 = arith.addf %284, %325 : vector<2x128xf32>
    %327 = arith.addf %326, %10 : vector<2x128xf32>
    %cst_70 = arith.constant dense<0.000000e+00> : vector<2x128xf32>
    %328 = tpu.matmul %303, %0, %cst_70 {dimension_numbers = #tpu.dot_dimension_numbers<[1], [0], [0], [1], [0, 0, 1, 1], [], []>} : vector<2x32xbf16>, vector<32x128xbf16>, vector<2x128xf32> -> vector<2x128xf32>
    %329 = arith.addf %327, %328 : vector<2x128xf32>
    %330 = arith.negf %329 : vector<2x128xf32>
    %331 = math.exp %330 : vector<2x128xf32>
    %cst_71 = arith.constant 1.000000e+00 : f32
    %332 = vector.broadcast %cst_71 : f32 to vector<2x128xf32>
    %333 = arith.addf %332, %331 : vector<2x128xf32>
    %334 = arith.divf %332, %333 : vector<2x128xf32>
    %335 = arith.mulf %334, %16 : vector<2x128xf32>
    %336 = arith.addf %335, %19 : vector<2x128xf32>
    %337 = vector.extract_strided_slice %336 {offsets = [0, 0], sizes = [2, 32], strides = [1, 1]} : vector<2x128xf32> to vector<2x32xf32>
    %338 = vector.extract_strided_slice %336 {offsets = [0, 32], sizes = [2, 32], strides = [1, 1]} : vector<2x128xf32> to vector<2x32xf32>
    %339 = vector.extract_strided_slice %336 {offsets = [0, 64], sizes = [2, 32], strides = [1, 1]} : vector<2x128xf32> to vector<2x32xf32>
    %340 = vector.extract_strided_slice %336 {offsets = [0, 96], sizes = [2, 32], strides = [1, 1]} : vector<2x128xf32> to vector<2x32xf32>
    %341 = arith.mulf %338, %300 : vector<2x32xf32>
    %342 = arith.mulf %337, %339 : vector<2x32xf32>
    %343 = arith.addf %341, %342 : vector<2x32xf32>
    %344 = math.tanh %343 : vector<2x32xf32>
    %345 = arith.mulf %340, %344 : vector<2x32xf32>
    %346 = arith.truncf %345 : vector<2x32xf32> to vector<2x32xbf16>
    %cst_72 = arith.constant dense<0.000000e+00> : vector<2x128xf32>
    %347 = tpu.matmul %346, %1, %cst_72 {dimension_numbers = #tpu.dot_dimension_numbers<[1], [0], [0], [1], [0, 0, 1, 1], [], []>} : vector<2x32xbf16>, vector<32x128xbf16>, vector<2x128xf32> -> vector<2x128xf32>
    %cst_73 = arith.constant dense<0.000000e+00> : vector<2x128xf32>
    %348 = tpu.matmul %324, %2, %cst_73 {dimension_numbers = #tpu.dot_dimension_numbers<[1], [0], [0], [1], [0, 0, 1, 1], [], []>} : vector<2x32xbf16>, vector<32x128xbf16>, vector<2x128xf32> -> vector<2x128xf32>
    %349 = arith.addf %347, %348 : vector<2x128xf32>
    %350 = arith.addf %349, %7 : vector<2x128xf32>
    %351 = arith.negf %350 : vector<2x128xf32>
    %352 = math.exp %351 : vector<2x128xf32>
    %cst_74 = arith.constant 1.000000e+00 : f32
    %353 = vector.broadcast %cst_74 : f32 to vector<2x128xf32>
    %354 = arith.addf %353, %352 : vector<2x128xf32>
    %355 = arith.divf %353, %354 : vector<2x128xf32>
    %356 = arith.mulf %355, %16 : vector<2x128xf32>
    %357 = arith.addf %356, %19 : vector<2x128xf32>
    %358 = vector.extract_strided_slice %357 {offsets = [0, 0], sizes = [2, 32], strides = [1, 1]} : vector<2x128xf32> to vector<2x32xf32>
    %359 = vector.extract_strided_slice %357 {offsets = [0, 32], sizes = [2, 32], strides = [1, 1]} : vector<2x128xf32> to vector<2x32xf32>
    %360 = vector.extract_strided_slice %357 {offsets = [0, 64], sizes = [2, 32], strides = [1, 1]} : vector<2x128xf32> to vector<2x32xf32>
    %361 = vector.extract_strided_slice %357 {offsets = [0, 96], sizes = [2, 32], strides = [1, 1]} : vector<2x128xf32> to vector<2x32xf32>
    %362 = arith.mulf %359, %321 : vector<2x32xf32>
    %363 = arith.mulf %358, %360 : vector<2x32xf32>
    %364 = arith.addf %362, %363 : vector<2x32xf32>
    %365 = math.tanh %364 : vector<2x32xf32>
    %366 = arith.mulf %361, %365 : vector<2x32xf32>
    %367 = arith.truncf %366 : vector<2x32xf32> to vector<2x32xbf16>
    %c0_75 = arith.constant 0 : index
    %c0_76 = arith.constant 0 : index
    %368 = vector.load %arg4[%c0_75, %c0_76] : memref<2x16xf32, #tpu.memory_space<vmem>>, vector<2x16xf32>
    %cst_77 = arith.constant dense<0.000000e+00> : vector<2x16xf32>
    %369 = tpu.matmul %66, %4, %cst_77 {dimension_numbers = #tpu.dot_dimension_numbers<[1], [0], [0], [1], [0, 0, 1, 1], [], []>} : vector<2x32xbf16>, vector<32x16xbf16>, vector<2x16xf32> -> vector<2x16xf32>
    %370 = arith.addf %369, %13 : vector<2x16xf32>
    %371 = arith.addf %370, %368 : vector<2x16xf32>
    %cst_78 = arith.constant dense<0.000000e+00> : vector<2x16xf32>
    %372 = tpu.matmul %109, %4, %cst_78 {dimension_numbers = #tpu.dot_dimension_numbers<[1], [0], [0], [1], [0, 0, 1, 1], [], []>} : vector<2x32xbf16>, vector<32x16xbf16>, vector<2x16xf32> -> vector<2x16xf32>
    %373 = arith.addf %372, %13 : vector<2x16xf32>
    %374 = arith.addf %373, %371 : vector<2x16xf32>
    %cst_79 = arith.constant dense<0.000000e+00> : vector<2x16xf32>
    %375 = tpu.matmul %152, %4, %cst_79 {dimension_numbers = #tpu.dot_dimension_numbers<[1], [0], [0], [1], [0, 0, 1, 1], [], []>} : vector<2x32xbf16>, vector<32x16xbf16>, vector<2x16xf32> -> vector<2x16xf32>
    %376 = arith.addf %375, %13 : vector<2x16xf32>
    %377 = arith.addf %376, %374 : vector<2x16xf32>
    %cst_80 = arith.constant dense<0.000000e+00> : vector<2x16xf32>
    %378 = tpu.matmul %195, %4, %cst_80 {dimension_numbers = #tpu.dot_dimension_numbers<[1], [0], [0], [1], [0, 0, 1, 1], [], []>} : vector<2x32xbf16>, vector<32x16xbf16>, vector<2x16xf32> -> vector<2x16xf32>
    %379 = arith.addf %378, %13 : vector<2x16xf32>
    %380 = arith.addf %379, %377 : vector<2x16xf32>
    %cst_81 = arith.constant dense<0.000000e+00> : vector<2x16xf32>
    %381 = tpu.matmul %238, %4, %cst_81 {dimension_numbers = #tpu.dot_dimension_numbers<[1], [0], [0], [1], [0, 0, 1, 1], [], []>} : vector<2x32xbf16>, vector<32x16xbf16>, vector<2x16xf32> -> vector<2x16xf32>
    %382 = arith.addf %381, %13 : vector<2x16xf32>
    %383 = arith.addf %382, %380 : vector<2x16xf32>
    %cst_82 = arith.constant dense<0.000000e+00> : vector<2x16xf32>
    %384 = tpu.matmul %281, %4, %cst_82 {dimension_numbers = #tpu.dot_dimension_numbers<[1], [0], [0], [1], [0, 0, 1, 1], [], []>} : vector<2x32xbf16>, vector<32x16xbf16>, vector<2x16xf32> -> vector<2x16xf32>
    %385 = arith.addf %384, %13 : vector<2x16xf32>
    %386 = arith.addf %385, %383 : vector<2x16xf32>
    %cst_83 = arith.constant dense<0.000000e+00> : vector<2x16xf32>
    %387 = tpu.matmul %324, %4, %cst_83 {dimension_numbers = #tpu.dot_dimension_numbers<[1], [0], [0], [1], [0, 0, 1, 1], [], []>} : vector<2x32xbf16>, vector<32x16xbf16>, vector<2x16xf32> -> vector<2x16xf32>
    %388 = arith.addf %387, %13 : vector<2x16xf32>
    %389 = arith.addf %388, %386 : vector<2x16xf32>
    %cst_84 = arith.constant dense<0.000000e+00> : vector<2x16xf32>
    %390 = tpu.matmul %367, %4, %cst_84 {dimension_numbers = #tpu.dot_dimension_numbers<[1], [0], [0], [1], [0, 0, 1, 1], [], []>} : vector<2x32xbf16>, vector<32x16xbf16>, vector<2x16xf32> -> vector<2x16xf32>
    %391 = arith.addf %390, %13 : vector<2x16xf32>
    %392 = arith.addf %391, %389 : vector<2x16xf32>
    %393 = tpu.concatenate %371, %374, %377, %380, %383, %386, %389, %392 in 1 : vector<2x16xf32>, vector<2x16xf32>, vector<2x16xf32>, vector<2x16xf32>, vector<2x16xf32>, vector<2x16xf32>, vector<2x16xf32>, vector<2x16xf32> -> vector<2x128xf32>
    %c0_85 = arith.constant 0 : index
    %c0_86 = arith.constant 0 : index
    %394 = vector.load %arg16[%c0_85, %c0_86] : memref<2x128xf32, #tpu.memory_space<vmem>>, vector<2x128xf32>
    tpu.vector_store %arg16[%c0_85, %c0_86], %393 {strides = array<i32>} : memref<2x128xf32, #tpu.memory_space<vmem>>, vector<2x128xf32>,
    %395 = tpu.concatenate %63, %106, %149, %192, %235, %278, %321, %364 in 1 : vector<2x32xf32>, vector<2x32xf32>, vector<2x32xf32>, vector<2x32xf32>, vector<2x32xf32>, vector<2x32xf32>, vector<2x32xf32>, vector<2x32xf32> -> vector<2x256xf32>
    %c0_87 = arith.constant 0 : index
    %c0_88 = arith.constant 0 : index
    %396 = vector.load %arg17[%c0_87, %c0_88] : memref<2x256xf32, #tpu.memory_space<vmem>>, vector<2x256xf32>
    tpu.vector_store %arg17[%c0_87, %c0_88], %395 {strides = array<i32>} : memref<2x256xf32, #tpu.memory_space<vmem>>, vector<2x256xf32>,
    return
  }
  func.func @transform_0(%arg0: i32) -> (i32, i32) {
    %c0_i32 = arith.constant 0 : i32
    %c0_i32_0 = arith.constant 0 : i32
    %c0_i32_1 = arith.constant 0 : i32
    return %c0_i32, %c0_i32_0 : i32, i32
  }
  func.func @transform_1(%arg0: i32) -> (i32, i32) {
    %c0_i32 = arith.constant 0 : i32
    %c0_i32_0 = arith.constant 0 : i32
    %c0_i32_1 = arith.constant 0 : i32
    return %c0_i32, %c0_i32_0 : i32, i32
  }
  func.func @transform_2(%arg0: i32) -> (i32, i32) {
    %c0_i32 = arith.constant 0 : i32
    %c0_i32_0 = arith.constant 0 : i32
    %c0_i32_1 = arith.constant 0 : i32
    return %c0_i32, %c0_i32_0 : i32, i32
  }
  func.func @transform_3(%arg0: i32) -> (i32, i32) {
    %c0_i32 = arith.constant 0 : i32
    %c0_i32_0 = arith.constant 0 : i32
    %c0_i32_1 = arith.constant 0 : i32
    return %c0_i32, %c0_i32_0 : i32, i32
  }
  func.func @transform_4(%arg0: i32) -> (i32, i32) {
    %c0_i32 = arith.constant 0 : i32
    %c0_i32_0 = arith.constant 0 : i32
    %c0_i32_1 = arith.constant 0 : i32
    return %c0_i32, %c0_i32_0 : i32, i32
  }
  func.func @transform_5(%arg0: i32) -> (i32, i32) {
    %c0_i32 = arith.constant 0 : i32
    %c0_i32_0 = arith.constant 0 : i32
    %c0_i32_1 = arith.constant 0 : i32
    return %c0_i32, %c0_i32_0 : i32, i32
  }
  func.func @transform_6(%arg0: i32) -> (i32, i32) {
    %c0_i32 = arith.constant 0 : i32
    %c0_i32_0 = arith.constant 0 : i32
    %c0_i32_1 = arith.constant 0 : i32
    return %c0_i32, %c0_i32_0 : i32, i32
  }
  func.func @transform_7(%arg0: i32) -> (i32, i32) {
    %c0_i32 = arith.constant 0 : i32
    %c0_i32_0 = arith.constant 0 : i32
    %c0_i32_1 = arith.constant 0 : i32
    return %c0_i32, %c0_i32_0 : i32, i32
  }
  func.func @transform_8(%arg0: i32) -> (i32, i32) {
    %c0_i32 = arith.constant 0 : i32
    %c0_i32_0 = arith.constant 0 : i32
    %c0_i32_1 = arith.constant 0 : i32
    return %c0_i32, %c0_i32_0 : i32, i32
  }
  func.func @transform_9(%arg0: i32) -> (i32, i32) {
    %c0_i32 = arith.constant 0 : i32
    %c0_i32_0 = arith.constant 0 : i32
    %c0_i32_1 = arith.constant 0 : i32
    return %c0_i32, %c0_i32_0 : i32, i32
  }
  func.func @transform_10(%arg0: i32) -> (i32, i32) {
    %c0_i32 = arith.constant 0 : i32
    %c0_i32_0 = arith.constant 0 : i32
    %c0_i32_1 = arith.constant 0 : i32
    return %c0_i32, %c0_i32_0 : i32, i32
  }
  func.func @transform_11(%arg0: i32) -> (i32, i32) {
    %c0_i32 = arith.constant 0 : i32
    %c0_i32_0 = arith.constant 0 : i32
    %c0_i32_1 = arith.constant 0 : i32
    return %c0_i32, %c0_i32_0 : i32, i32
  }
  func.func @transform_12(%arg0: i32) -> (i32, i32) {
    %c0_i32 = arith.constant 0 : i32
    %c0_i32_0 = arith.constant 0 : i32
    %c0_i32_1 = arith.constant 0 : i32
    return %c0_i32, %c0_i32_0 : i32, i32
  }
  func.func @transform_13(%arg0: i32) -> (i32, i32) {
    %c0_i32 = arith.constant 0 : i32
    %c0_i32_0 = arith.constant 0 : i32
    %c0_i32_1 = arith.constant 0 : i32
    return %c0_i32, %c0_i32_0 : i32, i32
  }
  func.func @transform_14(%arg0: i32) -> (i32, i32) {
    %c0_i32 = arith.constant 0 : i32
    %c0_i32_0 = arith.constant 0 : i32
    %c0_i32_1 = arith.constant 0 : i32
    return %c0_i32, %c0_i32_0 : i32, i32
  }
  func.func @transform_15(%arg0: i32) -> (i32, i32) {
    %c0_i32 = arith.constant 0 : i32
    %c0_i32_0 = arith.constant 0 : i32
    %c0_i32_1 = arith.constant 0 : i32
    return %c0_i32, %c0_i32_0 : i32, i32
  }
  func.func @transform_16(%arg0: i32) -> (i32, i32) {
    %c0_i32 = arith.constant 0 : i32
    %c0_i32_0 = arith.constant 0 : i32
    %c0_i32_1 = arith.constant 0 : i32
    return %c0_i32, %c0_i32_0 : i32, i32
  }
}

</mosaic_0001>

<bundles_post_ra>
// kernel: lstm_decoder_pallas.1
= control target key start
LH: loop header
LB: loop body
LE: loop exit
PB: predicated region body
PF: predicated region fallthrough
CT: control target
= control target key end

     0   :  { %v3019_v0 = vmov 0.0   ;;  %vm3020_vm0 = vmmov 0   ;;  %vm126_vm1 = vcmask 261120   ;;  %s3021_s17 = smov 64   ;;  %s3022_s20 = smov 32   ;;  %vm2324_vm2 = vcmask 130048   ;;  %s3788_s5 = inlined_call_operand.vmem [shape: bf16[32,128], index: 5, kind: input, shape index: {}]   ;;  %s3789_s0 = inlined_call_operand.vmem [shape: f32[2,32], index: 0, kind: input, shape index: {}]   ;;  %s3790_s4 = inlined_call_operand.vmem [shape: f32[2,128], index: 4, kind: input, shape index: {}]   ;;  %s3791_s13 = inlined_call_operand.vmem [shape: f32[1,128], index: 13, kind: input, shape index: {}]   ;;  %s3792_s14 = inlined_call_operand.vmem [shape: f32[1,128], index: 14, kind: input, shape index: {}]   ;;  %s3793_s1 = inlined_call_operand.vmem [shape: f32[2,32], index: 1, kind: input, shape index: {}]   ;;  %s3794_s7 = inlined_call_operand.vmem [shape: bf16[32,128], index: 7, kind: input, shape index: {}]   ;;  %s3795_s6 = inlined_call_operand.vmem [shape: bf16[32,128], index: 6, kind: input, shape index: {}]   ;;  %s3796_s2 = inlined_call_operand.vmem [shape: f32[2,32], index: 2, kind: input, shape index: {}]   ;;  %s3797_s8 = inlined_call_operand.vmem [shape: f32[1,128], index: 8, kind: input, shape index: {}]   ;;  %s3798_s9 = inlined_call_operand.vmem [shape: bf16[32,128], index: 9, kind: input, shape index: {}]   ;;  %s3799_s10 = inlined_call_operand.vmem [shape: f32[1,128], index: 10, kind: input, shape index: {}]   ;;  %s3800_s11 = inlined_call_operand.vmem [shape: bf16[32,16], index: 11, kind: input, shape index: {}]   ;;  %s3801_s12 = inlined_call_operand.vmem [shape: f32[1,16], index: 12, kind: input, shape index: {}]   ;;  %s3802_s3 = inlined_call_operand.vmem [shape: f32[2,16], index: 3, kind: input, shape index: {}]   ;;  %s3803_s16 = inlined_call_operand.vmem [shape: f32[2,256], index: 16, kind: output, shape index: {1}]   ;;  %s3804_s15 = inlined_call_operand.vmem [shape: f32[2,128], index: 15, kind: output, shape index: {0}]  }
   0x1   :  { %3806 = sst [smem:[#allocation2_spill]] %s3788_s5  ;;  %2576 = vmatprep.subr.bf16.mxu0 %v3019_v0  ;;  %2580 = vmatprep.mubr.msk.bf16.mxu0 %vm3020_vm0, %v3019_v0  ;;  %v108_v3 = vld [vmem:[%s3789_s0] sm:$0x3]  ;;  %v3183_v28 = vld [vmem:[%s3794_s7 + $0x8] sm:$0xff]   ;;  %s3025_s25 = smov 96   ;;  %vm2327_vm3 = vcmask 392192  }
   0x2   :  { %s3807_s23 = sld [smem:[#allocation2_spill]]  ;;  %2584 = vmatprep.subr.bf16.mxu1 %v3019_v0  ;;  %2588 = vmatprep.mubr.msk.bf16.mxu1 %vm3020_vm0, %v3019_v0  ;;  %v109_v4 = vpack.c.bf16 %v108_v3, %v108_v3  ;;  %v3142_v5 = vld [vmem:[%s3790_s4] sm:$0x3]  ;;  %v3190_v29 = vld [vmem:[%s3795_s6 + $0x8] sm:$0xff]   ;;  %vm2329_vm4 = vcmask 523264   ;;  %vm2333_vm5 = vcmask 785408  }
   0x3   :  { %v3148_v14 = vld [vmem:[%s3791_s13] ss:$0 sm:$0xff]  ;;  %v3242_v3 = vld [vmem:[%s3798_s9 + $0x8] sm:$0xff]   ;;  %vm2331_vm6 = vcmask 654336   ;;  %s3027_s26 = smov 112   ;;  %vm2335_vm7 = vcmask 916480  }
   0x4   :  { %v3153_v16 = vld [vmem:[%s3792_s14] ss:$0 sm:$0xff] }
   0x5   :  { %v112_v19 = vld [vmem:[%s3793_s1] sm:$0x3] }
   0x6   :  { %v3172_v26 = vld [vmem:[%s3794_s7] sm:$0xff]  }
   0x7   :  { %v3177_v27 = vld [vmem:[%s3795_s6] sm:$0xff]   ;;  %2585 = vmatpush3.bf16.msra.mxu1 %v3172_v26 }
   0x8   :  { %v3117_v1 = vld [vmem:[%s3807_s23] sm:$0xff]   ;;  %v3128_v2 = vld [vmem:[%s3807_s23 + $0x8] sm:$0xff]   ;;  %2586 = vmatprep.subr.bf16.mxu1 %v3019_v0 }
   0x9   :  { %2577 = vmatpush3.bf16.msra.mxu0 %v3117_v1  ;;  %v110_v30 = vld [vmem:[%s3796_s2] sm:$0x3] }
   0xa   :  { %2578 = vmatprep.subr.bf16.mxu0 %v3019_v0  ;;  %v111_v31 = vpack.c.bf16 %v110_v30, %v110_v30  ;;  %v3222_v41 = vld [vmem:[%s3797_s8] ss:$0 sm:$0xff] }
   0xb   :  { %2587 = vmatpush3.bf16.msra.mxu1 %v3183_v28  ;;  %v3236_v63 = vld [vmem:[%s3798_s9] sm:$0xff]  }
   0xc   :  { %2600 = vmatprep.subr.bf16.mxu1 %v3019_v0 }
   0xd   :  { %2579 = vmatpush3.bf16.msra.mxu0 %v3128_v2 }
   0xe   :  { %2592 = vmatprep.subr.bf16.mxu0 %v3019_v0  ;;  %2589 = vmatmul.mubr.msk.bf16.vlgmr.msra.gmra.mrb[0].mxu1 %vm126_vm1, %v111_v31 }
   0xf   :  { %2604 = vmatprep.mubr.msk.bf16.mxu1 %vm3020_vm0, %v3019_v0  ;;  %2601 = vmatpush3.bf16.msra.mxu1 %v3236_v63 }
  0x10   :  { %2581 = vmatmul.mubr.msk.bf16.vlgmr.msra.gmra.mrb[0].mxu0 %vm126_vm1, %v109_v4  ;;  %2602 = vmatprep.subr.bf16.mxu1 %v3019_v0 }
  0x11   :  { %2596 = vmatprep.mubr.msk.bf16.mxu0 %vm3020_vm0, %v3019_v0  ;;  %2593 = vmatpush3.bf16.msra.mxu0 %v3177_v27 }
  0x12   :  { %2594 = vmatprep.subr.bf16.mxu0 %v3019_v0 }
  0x13   :  { %2603 = vmatpush3.bf16.msra.mxu1 %v3242_v3 }
  0x14   :  { %2616 = vmatprep.subr.bf16.mxu1 %v3019_v0 }
  0x15   :  { %2595 = vmatpush3.bf16.msra.mxu0 %v3190_v29 }
  0x16   :  { %2608 = vmatprep.subr.bf16.mxu0 %v3019_v0 }
  0xe1   :  { %v250_v36 = vpop.f32.mrb[0].mxu1 }
  0xe2   :  { %v2590_v37 = vpop.f32.mrb[1].mxu1 }
  0xe3   :  { %v164_v6 = vpop.f32.mrb[0].mxu0  ;;  %v253_v38 = vpop.f32.mrb[2].mxu1 }
  0xe4   :  { %v170_v7 = vadd.f32 %v164_v6, %v3142_v5  ;;  %v2582_v8 = vpop.f32.mrb[1].mxu0  ;;  %v2591_v39 = vpop.f32.mrb[3].mxu1 }
  0xe5   :  { %v167_v9 = vpop.f32.mrb[2].mxu0 }
  0xe6   :  { %v2396_v10 = vmul.f32 -1.442695, %v170_v7  ;;  %v2583_v11 = vpop.f32.mrb[3].mxu0 }
  0xe8   :  { %2913 = vpow2.f32 %v2396_v10  ;;  %v3270_v10 = vld [vmem:[%s3799_s10] ss:$0 sm:$0xff] }
  0xf2   :  { %v2914_v12 = vpop.eup %2913 }
  0xf3   :  { %v174_v13 = vadd.f32 1.0, %v2914_v12 }
  0xf5   :  { %2915 = vrcp.f32 %v174_v13 }
  0xff   :  { %v2916_v15 = vpop.eup %2915 }
 0x100   :  { %v177_v17 = vmul.f32 %v2916_v15, %v3148_v14 }
 0x102   :  { %v178_v18 = vadd.f32 %v3153_v16, %v177_v17 }
 0x104   :  { %185 = vrot.lane.b32.xlu0 %v178_v18, %s3021_s17 }
 0x108   :  { %180 = vrot.lane.b32.xlu0 %v112_v19, %s3022_s20 }
 0x176   :  { %v186_v20 = vpop.permute.xlu0 %185 }
 0x177   :  { %v188_v21 = vmul.f32 %v186_v20, %v178_v18 }
 0x179   :  { %190 = vrot.lane.b32.xlu1 %v188_v21, %s3022_s20 }
 0x17a   :  { %v3163_v22 = vpop.permute.xlu0 %180 }
 0x17b   :  { %v183_v23 = vmul.f32 %v3163_v22, %v178_v18 }
 0x1eb   :  { %v191_v24 = vpop.permute.xlu1 %190 }
 0x1ec   :  { %v3166_v25 = vadd.f32 %v191_v24, %v183_v23 }
 0x1ee   :  { %2917 = vtanh.f32 %v3166_v25 }
 0x1f8   :  { %v2918_v32 = vpop.eup %2917 }
 0x1f9   :  { %196 = vrot.lane.b32.xlu1 %v2918_v32, %s3021_s17 }
 0x26b   :  { %v197_v33 = vpop.permute.xlu1 %196 }
 0x26c   :  { %v199_v34 = vmul.f32 %v197_v33, %v178_v18 }
 0x26e   :  { %v200_v35 = vpack.c.bf16 %v199_v34, %v199_v34 }
 0x270   :  { %257 = vrot.lane.b32.xlu0 %v200_v35, %s3022_s20 }
 0x2e2   :  { %v258_v40 = vpop.permute.xlu0 %257 }
 0x2e3   :  { %2597 = vmatmul.mubr.msk.bf16.vlgmr.msra.gmra.mrb[4].mxu0 %vm126_vm1, %v258_v40 }
 0x2e4   :  { %2609 = vmatpush3.bf16.msra.mxu0 %v3117_v1  ;;  %2612 = vmatprep.mubr.msk.bf16.mxu0 %vm3020_vm0, %v3019_v0 }
 0x2e5   :  { %2610 = vmatprep.subr.bf16.mxu0 %v3019_v0 }
 0x2e8   :  { %2611 = vmatpush3.bf16.msra.mxu0 %v3128_v2 }
 0x2e9   :  { %2624 = vmatprep.subr.bf16.mxu0 %v3019_v0 }
 0x2eb   :  { %2613 = vmatmul.mubr.msk.bf16.vlgmr.msra.gmra.mrb[8].mxu0 %vm126_vm1, %v258_v40 }
 0x2ec   :  { %2625 = vmatpush3.bf16.msra.mxu0 %v3177_v27  ;;  %2628 = vmatprep.mubr.msk.bf16.mxu0 %vm3020_vm0, %v3019_v0 }
 0x2ed   :  { %2626 = vmatprep.subr.bf16.mxu0 %v3019_v0 }
 0x2f0   :  { %2627 = vmatpush3.bf16.msra.mxu0 %v3190_v29 }
 0x2f1   :  { %2640 = vmatprep.subr.bf16.mxu0 %v3019_v0 }
 0x3b6   :  { %v308_v42 = vpop.f32.mrb[4].mxu0 }
 0x3b7   :  { %v309_v43 = vadd.f32 %v308_v42, %v250_v36  ;;  %v2598_v44 = vpop.f32.mrb[5].mxu0 }
 0x3b8   :  { %v311_v45 = vpop.f32.mrb[6].mxu0 }
 0x3b9   :  { %v314_v46 = vadd.f32 %v3222_v41, %v309_v43  ;;  %v2599_v47 = vpop.f32.mrb[7].mxu0 }
 0x3bb   :  { %v2403_v48 = vmul.f32 -1.442695, %v314_v46 }
 0x3bd   :  { %2919 = vpow2.f32 %v2403_v48 }
 0x3be   :  { %v435_v49 = vpop.f32.mrb[8].mxu0 }
 0x3bf   :  { %v2614_v50 = vpop.f32.mrb[9].mxu0 }
 0x3c0   :  { %v438_v51 = vpop.f32.mrb[10].mxu0 }
 0x3c1   :  { %v2615_v52 = vpop.f32.mrb[11].mxu0 }
 0x3c7   :  { %v2920_v53 = vpop.eup %2919 }
 0x3c8   :  { %v318_v54 = vadd.f32 1.0, %v2920_v53 }
 0x3ca   :  { %2921 = vrcp.f32 %v318_v54 }
 0x3d4   :  { %v2922_v55 = vpop.eup %2921 }
 0x3d5   :  { %v321_v56 = vmul.f32 %v2922_v55, %v3148_v14 }
 0x3d7   :  { %v322_v57 = vadd.f32 %v3153_v16, %v321_v56 }
 0x3d9   :  { %325 = vrot.lane.b32.xlu1 %v322_v57, %s3021_s17  ;;  %v323_v60 = vmul.f32 %v322_v57, %v3163_v22 }
 0x44b   :  { %v326_v58 = vpop.permute.xlu1 %325 }
 0x44c   :  { %v328_v59 = vmul.f32 %v326_v58, %v322_v57 }
 0x44e   :  { %330 = vrot.lane.b32.xlu0 %v328_v59, %s3022_s20 }
 0x4c0   :  { %v331_v61 = vpop.permute.xlu0 %330 }
 0x4c1   :  { %v3230_v62 = vadd.f32 %v331_v61, %v323_v60 }
 0x4c3   :  { %2923 = vtanh.f32 %v3230_v62 }
 0x4cd   :  { %v2924_v4 = vpop.eup %2923 }
 0x4ce   :  { %336 = vrot.lane.b32.xlu1 %v2924_v4, %s3021_s17 }
 0x540   :  { %v337_v6 = vpop.permute.xlu1 %336 }
 0x541   :  { %v339_v7 = vmul.f32 %v337_v6, %v322_v57 }
 0x543   :  { %v340_v8 = vpack.c.bf16 %v339_v7, %v339_v7 }
 0x545   :  { %342 = vrot.lane.b32.xlu0 %v340_v8, %s3022_s20 }
 0x5b7   :  { %v3249_v9 = vpop.permute.xlu0 %342 }
 0x5b8   :  { %2605 = vmatmul.mubr.msk.bf16.vlgmr.msra.gmra.mrb[4].mxu1 %vm126_vm1, %v3249_v9 }
 0x5b9   :  { %2617 = vmatpush3.bf16.msra.mxu1 %v3172_v26  ;;  %2620 = vmatprep.mubr.msk.bf16.mxu1 %vm3020_vm0, %v3019_v0 }
 0x5ba   :  { %2618 = vmatprep.subr.bf16.mxu1 %v3019_v0 }
 0x5bd   :  { %2619 = vmatpush3.bf16.msra.mxu1 %v3183_v28 }
 0x5be   :  { %2632 = vmatprep.subr.bf16.mxu1 %v3019_v0 }
 0x5c0   :  { %2621 = vmatmul.mubr.msk.bf16.vlgmr.msra.gmra.mrb[8].mxu1 %vm126_vm1, %v3249_v9 }
 0x5c1   :  { %2633 = vmatpush3.bf16.msra.mxu1 %v3236_v63  ;;  %2636 = vmatprep.mubr.msk.bf16.mxu1 %vm3020_vm0, %v3019_v0 }
 0x5c2   :  { %2634 = vmatprep.subr.bf16.mxu1 %v3019_v0 }
 0x5c5   :  { %2635 = vmatpush3.bf16.msra.mxu1 %v3242_v3 }
 0x5c6   :  { %2648 = vmatprep.subr.bf16.mxu1 %v3019_v0 }
 0x68b   :  { %v393_v11 = vpop.f32.mrb[4].mxu1 }
 0x68c   :  { %v399_v12 = vadd.f32 %v393_v11, %v3142_v5  ;;  %v2606_v13 = vpop.f32.mrb[5].mxu1 }
 0x68d   :  { %v396_v15 = vpop.f32.mrb[6].mxu1 }
 0x68e   :  { %v3274_v17 = vadd.f32 %v3270_v10, %v399_v12  ;;  %v2607_v18 = vpop.f32.mrb[7].mxu1 }
 0x690   :  { %v441_v19 = vadd.f32 %v435_v49, %v3274_v17 }
 0x692   :  { %v2408_v20 = vmul.f32 -1.442695, %v441_v19 }
 0x693   :  { %v502_v21 = vpop.f32.mrb[8].mxu1 }
 0x694   :  { %2925 = vpow2.f32 %v2408_v20  ;;  %v2622_v22 = vpop.f32.mrb[9].mxu1 }
 0x695   :  { %v505_v23 = vpop.f32.mrb[10].mxu1 }
 0x696   :  { %v2623_v24 = vpop.f32.mrb[11].mxu1 }
 0x69e   :  { %v2926_v30 = vpop.eup %2925 }
 0x69f   :  { %v445_v31 = vadd.f32 1.0, %v2926_v30 }
 0x6a1   :  { %2927 = vrcp.f32 %v445_v31 }
 0x6ab   :  { %v2928_v32 = vpop.eup %2927 }
 0x6ac   :  { %v448_v5 = vmul.f32 %v2928_v32, %v3148_v14 }
 0x6ae   :  { %v449_v33 = vadd.f32 %v3153_v16, %v448_v5 }
 0x6b0   :  { %452 = vrot.lane.b32.xlu1 %v449_v33, %s3021_s17  ;;  %v450_v36 = vmul.f32 %v449_v33, %v3166_v25 }
 0x722   :  { %v453_v34 = vpop.permute.xlu1 %452 }
 0x723   :  { %v455_v35 = vmul.f32 %v453_v34, %v449_v33 }
 0x725   :  { %457 = vrot.lane.b32.xlu0 %v455_v35, %s3022_s20 }
 0x797   :  { %v458_v37 = vpop.permute.xlu0 %457 }
 0x798   :  { %v3282_v38 = vadd.f32 %v458_v37, %v450_v36 }
 0x79a   :  { %2929 = vtanh.f32 %v3282_v38 }
 0x7a4   :  { %v2930_v39 = vpop.eup %2929 }
 0x7a5   :  { %463 = vrot.lane.b32.xlu1 %v2930_v39, %s3021_s17 }
 0x817   :  { %v464_v40 = vpop.permute.xlu1 %463 }
 0x818   :  { %v466_v42 = vmul.f32 %v464_v40, %v449_v33 }
 0x81a   :  { %v467_v43 = vpack.c.bf16 %v466_v42, %v466_v42 }
 0x81c   :  { %509 = vrot.lane.b32.xlu0 %v467_v43, %s3022_s20 }
 0x88e   :  { %v510_v44 = vpop.permute.xlu0 %509 }
 0x88f   :  { %2629 = vmatmul.mubr.msk.bf16.vlgmr.msra.gmra.mrb[12].mxu0 %vm126_vm1, %v510_v44 }
 0x890   :  { %2641 = vmatpush3.bf16.msra.mxu0 %v3117_v1  ;;  %2644 = vmatprep.mubr.msk.bf16.mxu0 %vm3020_vm0, %v3019_v0 }
 0x891   :  { %2642 = vmatprep.subr.bf16.mxu0 %v3019_v0 }
 0x894   :  { %2643 = vmatpush3.bf16.msra.mxu0 %v3128_v2 }
 0x895   :  { %2656 = vmatprep.subr.bf16.mxu0 %v3019_v0 }
 0x897   :  { %2645 = vmatmul.mubr.msk.bf16.vlgmr.msra.gmra.mrb[16].mxu0 %vm126_vm1, %v510_v44 }
 0x898   :  { %2657 = vmatpush3.bf16.msra.mxu0 %v3177_v27  ;;  %2660 = vmatprep.mubr.msk.bf16.mxu0 %vm3020_vm0, %v3019_v0 }
 0x899   :  { %2658 = vmatprep.subr.bf16.mxu0 %v3019_v0 }
 0x89c   :  { %2659 = vmatpush3.bf16.msra.mxu0 %v3190_v29 }
 0x89d   :  { %2672 = vmatprep.subr.bf16.mxu0 %v3019_v0 }
 0x962   :  { %v548_v25 = vpop.f32.mrb[12].mxu0 }
 0x963   :  { %v549_v45 = vadd.f32 %v548_v25, %v502_v21  ;;  %v2630_v46 = vpop.f32.mrb[13].mxu0 }
 0x964   :  { %v551_v47 = vpop.f32.mrb[14].mxu0 }
 0x965   :  { %v554_v48 = vadd.f32 %v3222_v41, %v549_v45  ;;  %v2631_v49 = vpop.f32.mrb[15].mxu0 }
 0x967   :  { %v2411_v50 = vmul.f32 -1.442695, %v554_v48 }
 0x969   :  { %2931 = vpow2.f32 %v2411_v50 }
 0x96a   :  { %v663_v51 = vpop.f32.mrb[16].mxu0 }
 0x96b   :  { %v2646_v52 = vpop.f32.mrb[17].mxu0 }
 0x96c   :  { %v666_v53 = vpop.f32.mrb[18].mxu0 }
 0x96d   :  { %v2647_v54 = vpop.f32.mrb[19].mxu0 }
 0x973   :  { %v2932_v55 = vpop.eup %2931 }
 0x974   :  { %v558_v56 = vadd.f32 1.0, %v2932_v55 }
 0x976   :  { %2933 = vrcp.f32 %v558_v56 }
 0x980   :  { %v2934_v57 = vpop.eup %2933 }
 0x981   :  { %v561_v58 = vmul.f32 %v2934_v57, %v3148_v14 }
 0x983   :  { %v562_v59 = vadd.f32 %v3153_v16, %v561_v58 }
 0x985   :  { %565 = vrot.lane.b32.xlu1 %v562_v59, %s3021_s17  ;;  %v563_v4 = vmul.f32 %v562_v59, %v3230_v62 }
 0x9f7   :  { %v566_v60 = vpop.permute.xlu1 %565 }
 0x9f8   :  { %v568_v61 = vmul.f32 %v566_v60, %v562_v59 }
 0x9fa   :  { %570 = vrot.lane.b32.xlu0 %v568_v61, %s3022_s20 }
 0xa6c   :  { %v571_v6 = vpop.permute.xlu0 %570 }
 0xa6d   :  { %v3307_v7 = vadd.f32 %v571_v6, %v563_v4 }
 0xa6f   :  { %2935 = vtanh.f32 %v3307_v7 }
 0xa79   :  { %v2936_v8 = vpop.eup %2935 }
 0xa7a   :  { %576 = vrot.lane.b32.xlu1 %v2936_v8, %s3021_s17 }
 0xaec   :  { %v577_v11 = vpop.permute.xlu1 %576 }
 0xaed   :  { %v579_v12 = vmul.f32 %v577_v11, %v562_v59 }
 0xaef   :  { %v580_v13 = vpack.c.bf16 %v579_v12, %v579_v12 }
 0xaf1   :  { %582 = vrot.lane.b32.xlu0 %v580_v13, %s3022_s20 }
 0xb63   :  { %v3312_v15 = vpop.permute.xlu0 %582 }
 0xb64   :  { %2637 = vmatmul.mubr.msk.bf16.vlgmr.msra.gmra.mrb[12].mxu1 %vm126_vm1, %v3312_v15 }
 0xb65   :  { %2649 = vmatpush3.bf16.msra.mxu1 %v3172_v26  ;;  %2652 = vmatprep.mubr.msk.bf16.mxu1 %vm3020_vm0, %v3019_v0 }
 0xb66   :  { %2650 = vmatprep.subr.bf16.mxu1 %v3019_v0 }
 0xb69   :  { %2651 = vmatpush3.bf16.msra.mxu1 %v3183_v28 }
 0xb6a   :  { %2664 = vmatprep.subr.bf16.mxu1 %v3019_v0 }
 0xb6c   :  { %2653 = vmatmul.mubr.msk.bf16.vlgmr.msra.gmra.mrb[16].mxu1 %vm126_vm1, %v3312_v15 }
 0xb6d   :  { %2665 = vmatpush3.bf16.msra.mxu1 %v3236_v63  ;;  %2668 = vmatprep.mubr.msk.bf16.mxu1 %vm3020_vm0, %v3019_v0 }
 0xb6e   :  { %2666 = vmatprep.subr.bf16.mxu1 %v3019_v0 }
 0xb71   :  { %2667 = vmatpush3.bf16.msra.mxu1 %v3242_v3 }
 0xb72   :  { %2680 = vmatprep.subr.bf16.mxu1 %v3019_v0 }
 0xc37   :  { %v621_v18 = vpop.f32.mrb[12].mxu1 }
 0xc38   :  { %v627_v19 = vadd.f32 %v621_v18, %v3274_v17  ;;  %v2638_v20 = vpop.f32.mrb[13].mxu1 }
 0xc39   :  { %v624_v21 = vpop.f32.mrb[14].mxu1 }
 0xc3a   :  { %v3332_v22 = vadd.f32 %v3270_v10, %v627_v19  ;;  %v2639_v23 = vpop.f32.mrb[15].mxu1 }
 0xc3c   :  { %v669_v24 = vadd.f32 %v663_v51, %v3332_v22 }
 0xc3e   :  { %v2414_v30 = vmul.f32 -1.442695, %v669_v24 }
 0xc3f   :  { %v730_v31 = vpop.f32.mrb[16].mxu1 }
 0xc40   :  { %2937 = vpow2.f32 %v2414_v30  ;;  %v2654_v32 = vpop.f32.mrb[17].mxu1 }
 0xc41   :  { %v733_v5 = vpop.f32.mrb[18].mxu1 }
 0xc42   :  { %v2655_v33 = vpop.f32.mrb[19].mxu1 }
 0xc4a   :  { %v2938_v34 = vpop.eup %2937 }
 0xc4b   :  { %v673_v35 = vadd.f32 1.0, %v2938_v34 }
 0xc4d   :  { %2939 = vrcp.f32 %v673_v35 }
 0xc57   :  { %v2940_v36 = vpop.eup %2939 }
 0xc58   :  { %v676_v17 = vmul.f32 %v2940_v36, %v3148_v14 }
 0xc5a   :  { %v677_v37 = vadd.f32 %v3153_v16, %v676_v17 }
 0xc5c   :  { %680 = vrot.lane.b32.xlu1 %v677_v37, %s3021_s17  ;;  %v678_v42 = vmul.f32 %v677_v37, %v3282_v38 }
 0xcce   :  { %v681_v39 = vpop.permute.xlu1 %680 }
 0xccf   :  { %v683_v40 = vmul.f32 %v681_v39, %v677_v37 }
 0xcd1   :  { %685 = vrot.lane.b32.xlu0 %v683_v40, %s3022_s20 }
 0xd43   :  { %v686_v43 = vpop.permute.xlu0 %685 }
 0xd44   :  { %v3340_v44 = vadd.f32 %v686_v43, %v678_v42 }
 0xd46   :  { %2941 = vtanh.f32 %v3340_v44 }
 0xd50   :  { %v2942_v25 = vpop.eup %2941 }
 0xd51   :  { %691 = vrot.lane.b32.xlu1 %v2942_v25, %s3021_s17 }
 0xdc3   :  { %v692_v45 = vpop.permute.xlu1 %691 }
 0xdc4   :  { %v694_v46 = vmul.f32 %v692_v45, %v677_v37 }
 0xdc6   :  { %v695_v47 = vpack.c.bf16 %v694_v46, %v694_v46 }
 0xdc8   :  { %737 = vrot.lane.b32.xlu0 %v695_v47, %s3022_s20 }
 0xe3a   :  { %v738_v48 = vpop.permute.xlu0 %737 }
 0xe3b   :  { %2661 = vmatmul.mubr.msk.bf16.vlgmr.msra.gmra.mrb[20].mxu0 %vm126_vm1, %v738_v48 }
 0xe3c   :  { %2673 = vmatpush3.bf16.msra.mxu0 %v3117_v1  ;;  %2676 = vmatprep.mubr.msk.bf16.mxu0 %vm3020_vm0, %v3019_v0 }
 0xe3d   :  { %2674 = vmatprep.subr.bf16.mxu0 %v3019_v0 }
 0xe40   :  { %2675 = vmatpush3.bf16.msra.mxu0 %v3128_v2 }
 0xe41   :  { %2688 = vmatprep.subr.bf16.mxu0 %v3019_v0 }
 0xe43   :  { %2677 = vmatmul.mubr.msk.bf16.vlgmr.msra.gmra.mrb[24].mxu0 %vm126_vm1, %v738_v48 }
 0xe44   :  { %2689 = vmatpush3.bf16.msra.mxu0 %v3177_v27  ;;  %2692 = vmatprep.mubr.msk.bf16.mxu0 %vm3020_vm0, %v3019_v0 }
 0xe45   :  { %2690 = vmatprep.subr.bf16.mxu0 %v3019_v0 }
 0xe48   :  { %2691 = vmatpush3.bf16.msra.mxu0 %v3190_v29 }
 0xe49   :  { %2704 = vmatprep.subr.bf16.mxu0 %v3019_v0 }
 0xf0e   :  { %v776_v38 = vpop.f32.mrb[20].mxu0 }
 0xf0f   :  { %v777_v49 = vadd.f32 %v776_v38, %v730_v31  ;;  %v2662_v50 = vpop.f32.mrb[21].mxu0 }
 0xf10   :  { %v779_v51 = vpop.f32.mrb[22].mxu0 }
 0xf11   :  { %v782_v52 = vadd.f32 %v3222_v41, %v777_v49  ;;  %v2663_v53 = vpop.f32.mrb[23].mxu0 }
 0xf13   :  { %v2417_v54 = vmul.f32 -1.442695, %v782_v52 }
 0xf15   :  { %2943 = vpow2.f32 %v2417_v54 }
 0xf16   :  { %v891_v55 = vpop.f32.mrb[24].mxu0 }
 0xf17   :  { %v2678_v56 = vpop.f32.mrb[25].mxu0 }
 0xf18   :  { %v894_v57 = vpop.f32.mrb[26].mxu0 }
 0xf19   :  { %v2679_v58 = vpop.f32.mrb[27].mxu0 }
 0xf1f   :  { %v2944_v59 = vpop.eup %2943 }
 0xf20   :  { %v786_v60 = vadd.f32 1.0, %v2944_v59 }
 0xf22   :  { %2945 = vrcp.f32 %v786_v60 }
 0xf2c   :  { %v2946_v61 = vpop.eup %2945 }
 0xf2d   :  { %v789_v4 = vmul.f32 %v2946_v61, %v3148_v14 }
 0xf2f   :  { %v790_v6 = vadd.f32 %v3153_v16, %v789_v4 }
 0xf31   :  { %793 = vrot.lane.b32.xlu1 %v790_v6, %s3021_s17  ;;  %v791_v12 = vmul.f32 %v790_v6, %v3307_v7 }
 0xfa3   :  { %v794_v8 = vpop.permute.xlu1 %793 }
 0xfa4   :  { %v796_v11 = vmul.f32 %v794_v8, %v790_v6 }
 0xfa6   :  { %798 = vrot.lane.b32.xlu0 %v796_v11, %s3022_s20 }
0x1018   :  { %v799_v13 = vpop.permute.xlu0 %798 }
0x1019   :  { %v3365_v18 = vadd.f32 %v799_v13, %v791_v12 }
0x101b   :  { %2947 = vtanh.f32 %v3365_v18 }
0x1025   :  { %v2948_v19 = vpop.eup %2947 }
0x1026   :  { %804 = vrot.lane.b32.xlu1 %v2948_v19, %s3021_s17 }
0x1098   :  { %v805_v20 = vpop.permute.xlu1 %804 }
0x1099   :  { %v807_v21 = vmul.f32 %v805_v20, %v790_v6 }
0x109b   :  { %v808_v23 = vpack.c.bf16 %v807_v21, %v807_v21 }
0x109d   :  { %810 = vrot.lane.b32.xlu0 %v808_v23, %s3022_s20 }
0x110f   :  { %v3370_v24 = vpop.permute.xlu0 %810 }
0x1110   :  { %2669 = vmatmul.mubr.msk.bf16.vlgmr.msra.gmra.mrb[20].mxu1 %vm126_vm1, %v3370_v24 }
0x1111   :  { %2681 = vmatpush3.bf16.msra.mxu1 %v3172_v26  ;;  %2684 = vmatprep.mubr.msk.bf16.mxu1 %vm3020_vm0, %v3019_v0 }
0x1112   :  { %2682 = vmatprep.subr.bf16.mxu1 %v3019_v0 }
0x1115   :  { %2683 = vmatpush3.bf16.msra.mxu1 %v3183_v28 }
0x1116   :  { %2696 = vmatprep.subr.bf16.mxu1 %v3019_v0 }
0x1118   :  { %2685 = vmatmul.mubr.msk.bf16.vlgmr.msra.gmra.mrb[24].mxu1 %vm126_vm1, %v3370_v24 }
0x1119   :  { %2697 = vmatpush3.bf16.msra.mxu1 %v3236_v63  ;;  %2700 = vmatprep.mubr.msk.bf16.mxu1 %vm3020_vm0, %v3019_v0 }
0x111a   :  { %2698 = vmatprep.subr.bf16.mxu1 %v3019_v0 }
0x111d   :  { %2699 = vmatpush3.bf16.msra.mxu1 %v3242_v3 }
0x111e   :  { %2712 = vmatprep.subr.bf16.mxu1 %v3019_v0 }
0x11e3   :  { %v849_v30 = vpop.f32.mrb[20].mxu1 }
0x11e4   :  { %v855_v31 = vadd.f32 %v849_v30, %v3332_v22  ;;  %v2670_v32 = vpop.f32.mrb[21].mxu1 }
0x11e5   :  { %v852_v5 = vpop.f32.mrb[22].mxu1 }
0x11e6   :  { %v3390_v33 = vadd.f32 %v3270_v10, %v855_v31  ;;  %v2671_v34 = vpop.f32.mrb[23].mxu1 }
0x11e8   :  { %v897_v35 = vadd.f32 %v891_v55, %v3390_v33 }
0x11ea   :  { %v2420_v36 = vmul.f32 -1.442695, %v897_v35 }
0x11eb   :  { %v958_v17 = vpop.f32.mrb[24].mxu1 }
0x11ec   :  { %2949 = vpow2.f32 %v2420_v36  ;;  %v2686_v37 = vpop.f32.mrb[25].mxu1 }
0x11ed   :  { %v961_v39 = vpop.f32.mrb[26].mxu1 }
0x11ee   :  { %v2687_v40 = vpop.f32.mrb[27].mxu1 }
0x11f6   :  { %v2950_v42 = vpop.eup %2949 }
0x11f7   :  { %v901_v43 = vadd.f32 1.0, %v2950_v42 }
0x11f9   :  { %2951 = vrcp.f32 %v901_v43 }
0x1203   :  { %v2952_v25 = vpop.eup %2951 }
0x1204   :  { %v904_v22 = vmul.f32 %v2952_v25, %v3148_v14 }
0x1206   :  { %v905_v45 = vadd.f32 %v3153_v16, %v904_v22 }
0x1208   :  { %908 = vrot.lane.b32.xlu1 %v905_v45, %s3021_s17  ;;  %v906_v48 = vmul.f32 %v905_v45, %v3340_v44 }
0x127a   :  { %v909_v46 = vpop.permute.xlu1 %908 }
0x127b   :  { %v911_v47 = vmul.f32 %v909_v46, %v905_v45 }
0x127d   :  { %913 = vrot.lane.b32.xlu0 %v911_v47, %s3022_s20 }
0x12ef   :  { %v914_v38 = vpop.permute.xlu0 %913 }
0x12f0   :  { %v3398_v49 = vadd.f32 %v914_v38, %v906_v48 }
0x12f2   :  { %2953 = vtanh.f32 %v3398_v49 }
0x12fc   :  { %v2954_v50 = vpop.eup %2953 }
0x12fd   :  { %919 = vrot.lane.b32.xlu1 %v2954_v50, %s3021_s17 }
0x136f   :  { %v920_v51 = vpop.permute.xlu1 %919 }
0x1370   :  { %v922_v52 = vmul.f32 %v920_v51, %v905_v45 }
0x1372   :  { %v923_v53 = vpack.c.bf16 %v922_v52, %v922_v52 }
0x1374   :  { %965 = vrot.lane.b32.xlu0 %v923_v53, %s3022_s20 }
0x13e6   :  { %v966_v54 = vpop.permute.xlu0 %965 }
0x13e7   :  { %2693 = vmatmul.mubr.msk.bf16.vlgmr.msra.gmra.mrb[28].mxu0 %vm126_vm1, %v966_v54 }
0x13e8   :  { %2705 = vmatpush3.bf16.msra.mxu0 %v3117_v1  ;;  %2708 = vmatprep.mubr.msk.bf16.mxu0 %vm3020_vm0, %v3019_v0 }
0x13e9   :  { %2706 = vmatprep.subr.bf16.mxu0 %v3019_v0 }
0x13ec   :  { %2707 = vmatpush3.bf16.msra.mxu0 %v3128_v2 }
0x13ed   :  { %2720 = vmatprep.subr.bf16.mxu0 %v3019_v0 }
0x13ef   :  { %2709 = vmatmul.mubr.msk.bf16.vlgmr.msra.gmra.mrb[32].mxu0 %vm126_vm1, %v966_v54 }
0x13f0   :  { %2721 = vmatpush3.bf16.msra.mxu0 %v3177_v27  ;;  %2724 = vmatprep.mubr.msk.bf16.mxu0 %vm3020_vm0, %v3019_v0 }
0x13f1   :  { %2722 = vmatprep.subr.bf16.mxu0 %v3019_v0 }
0x13f4   :  { %2723 = vmatpush3.bf16.msra.mxu0 %v3190_v29 }
0x13f5   :  { %2736 = vmatprep.subr.bf16.mxu0 %v3019_v0 }
0x14ba   :  { %v1004_v44 = vpop.f32.mrb[28].mxu0 }
0x14bb   :  { %v1005_v55 = vadd.f32 %v1004_v44, %v958_v17  ;;  %v2694_v56 = vpop.f32.mrb[29].mxu0 }
0x14bc   :  { %v1007_v57 = vpop.f32.mrb[30].mxu0 }
0x14bd   :  { %v1010_v58 = vadd.f32 %v3222_v41, %v1005_v55  ;;  %v2695_v59 = vpop.f32.mrb[31].mxu0 }
0x14bf   :  { %v2423_v60 = vmul.f32 -1.442695, %v1010_v58 }
0x14c1   :  { %2955 = vpow2.f32 %v2423_v60 }
0x14c2   :  { %v1119_v61 = vpop.f32.mrb[32].mxu0 }
0x14c3   :  { %v2710_v4 = vpop.f32.mrb[33].mxu0 }
0x14c4   :  { %v1122_v6 = vpop.f32.mrb[34].mxu0 }
0x14c5   :  { %v2711_v8 = vpop.f32.mrb[35].mxu0 }
0x14cb   :  { %v2956_v11 = vpop.eup %2955 }
0x14cc   :  { %v1014_v12 = vadd.f32 1.0, %v2956_v11 }
0x14ce   :  { %2957 = vrcp.f32 %v1014_v12 }
0x14d8   :  { %v2958_v13 = vpop.eup %2957 }
0x14d9   :  { %v1017_v19 = vmul.f32 %v2958_v13, %v3148_v14 }
0x14db   :  { %v1018_v20 = vadd.f32 %v3153_v16, %v1017_v19 }
0x14dd   :  { %1021 = vrot.lane.b32.xlu1 %v1018_v20, %s3021_s17  ;;  %v1019_v30 = vmul.f32 %v1018_v20, %v3365_v18 }
0x154f   :  { %v1022_v21 = vpop.permute.xlu1 %1021 }
0x1550   :  { %v1024_v23 = vmul.f32 %v1022_v21, %v1018_v20 }
0x1552   :  { %1026 = vrot.lane.b32.xlu0 %v1024_v23, %s3022_s20 }
0x15c4   :  { %v1027_v31 = vpop.permute.xlu0 %1026 }
0x15c5   :  { %v3423_v32 = vadd.f32 %v1027_v31, %v1019_v30 }
0x15c7   :  { %2959 = vtanh.f32 %v3423_v32 }
0x15d1   :  { %v2960_v5 = vpop.eup %2959 }
0x15d2   :  { %1032 = vrot.lane.b32.xlu1 %v2960_v5, %s3021_s17 }
0x1644   :  { %v1033_v34 = vpop.permute.xlu1 %1032 }
0x1645   :  { %v1035_v35 = vmul.f32 %v1033_v34, %v1018_v20 }
0x1647   :  { %v1036_v36 = vpack.c.bf16 %v1035_v35, %v1035_v35 }
0x1649   :  { %1038 = vrot.lane.b32.xlu0 %v1036_v36, %s3022_s20 }
0x16bb   :  { %v3428_v17 = vpop.permute.xlu0 %1038 }
0x16bc   :  { %2701 = vmatmul.mubr.msk.bf16.vlgmr.msra.gmra.mrb[28].mxu1 %vm126_vm1, %v3428_v17 }
0x16bd   :  { %2713 = vmatpush3.bf16.msra.mxu1 %v3172_v26  ;;  %2716 = vmatprep.mubr.msk.bf16.mxu1 %vm3020_vm0, %v3019_v0 }
0x16be   :  { %2714 = vmatprep.subr.bf16.mxu1 %v3019_v0 }
0x16c1   :  { %2715 = vmatpush3.bf16.msra.mxu1 %v3183_v28 }
0x16c2   :  { %2728 = vmatprep.subr.bf16.mxu1 %v3019_v0 }
0x16c4   :  { %2717 = vmatmul.mubr.msk.bf16.vlgmr.msra.gmra.mrb[32].mxu1 %vm126_vm1, %v3428_v17 }
0x16c5   :  { %2729 = vmatpush3.bf16.msra.mxu1 %v3236_v63  ;;  %2732 = vmatprep.mubr.msk.bf16.mxu1 %vm3020_vm0, %v3019_v0 }
0x16c6   :  { %2730 = vmatprep.subr.bf16.mxu1 %v3019_v0 }
0x16c9   :  { %2731 = vmatpush3.bf16.msra.mxu1 %v3242_v3 }
0x16ca   :  { %2744 = vmatprep.subr.bf16.mxu1 %v3019_v0 }
0x178f   :  { %v1077_v37 = vpop.f32.mrb[28].mxu1 }
0x1790   :  { %v1083_v39 = vadd.f32 %v1077_v37, %v3390_v33  ;;  %v2702_v40 = vpop.f32.mrb[29].mxu1 }
0x1791   :  { %v1080_v42 = vpop.f32.mrb[30].mxu1 }
0x1792   :  { %v3448_v43 = vadd.f32 %v3270_v10, %v1083_v39  ;;  %v2703_v25 = vpop.f32.mrb[31].mxu1 }
0x1794   :  { %v1125_v22 = vadd.f32 %v1119_v61, %v3448_v43 }
0x1796   :  { %v2426_v45 = vmul.f32 -1.442695, %v1125_v22 }
0x1797   :  { %v1186_v46 = vpop.f32.mrb[32].mxu1 }
0x1798   :  { %2961 = vpow2.f32 %v2426_v45  ;;  %v2718_v47 = vpop.f32.mrb[33].mxu1 }
0x1799   :  { %v1189_v48 = vpop.f32.mrb[34].mxu1 }
0x179a   :  { %v2719_v38 = vpop.f32.mrb[35].mxu1 }
0x17a2   :  { %v2962_v50 = vpop.eup %2961 }
0x17a3   :  { %v1129_v51 = vadd.f32 1.0, %v2962_v50 }
0x17a5   :  { %2963 = vrcp.f32 %v1129_v51 }
0x17af   :  { %v2964_v52 = vpop.eup %2963 }
0x17b0   :  { %v1132_v33 = vmul.f32 %v2964_v52, %v3148_v14 }
0x17b2   :  { %v1133_v53 = vadd.f32 %v3153_v16, %v1132_v33 }
0x17b4   :  { %1136 = vrot.lane.b32.xlu1 %v1133_v53, %s3021_s17  ;;  %v1134_v55 = vmul.f32 %v1133_v53, %v3398_v49 }
0x1826   :  { %v1137_v54 = vpop.permute.xlu1 %1136 }
0x1827   :  { %v1139_v44 = vmul.f32 %v1137_v54, %v1133_v53 }
0x1829   :  { %1141 = vrot.lane.b32.xlu0 %v1139_v44, %s3022_s20 }
0x189b   :  { %v1142_v56 = vpop.permute.xlu0 %1141 }
0x189c   :  { %v3456_v57 = vadd.f32 %v1142_v56, %v1134_v55 }
0x189e   :  { %2965 = vtanh.f32 %v3456_v57 }
0x18a8   :  { %v2966_v58 = vpop.eup %2965 }
0x18a9   :  { %1147 = vrot.lane.b32.xlu1 %v2966_v58, %s3021_s17 }
0x191b   :  { %v1148_v59 = vpop.permute.xlu1 %1147 }
0x191c   :  { %v1150_v60 = vmul.f32 %v1148_v59, %v1133_v53 }
0x191e   :  { %v1151_v61 = vpack.c.bf16 %v1150_v60, %v1150_v60 }
0x1920   :  { %1193 = vrot.lane.b32.xlu0 %v1151_v61, %s3022_s20 }
0x1992   :  { %v1194_v4 = vpop.permute.xlu0 %1193 }
0x1993   :  { %2725 = vmatmul.mubr.msk.bf16.vlgmr.msra.gmra.mrb[36].mxu0 %vm126_vm1, %v1194_v4 }
0x1994   :  { %2737 = vmatpush3.bf16.msra.mxu0 %v3117_v1  ;;  %2740 = vmatprep.mubr.msk.bf16.mxu0 %vm3020_vm0, %v3019_v0 }
0x1995   :  { %2738 = vmatprep.subr.bf16.mxu0 %v3019_v0 }
0x1998   :  { %2739 = vmatpush3.bf16.msra.mxu0 %v3128_v2 }
0x1999   :  { %2752 = vmatprep.subr.bf16.mxu0 %v3019_v0 }
0x199b   :  { %2741 = vmatmul.mubr.msk.bf16.vlgmr.msra.gmra.mrb[40].mxu0 %vm126_vm1, %v1194_v4 }
0x199c   :  { %2753 = vmatpush3.bf16.msra.mxu0 %v3177_v27  ;;  %2756 = vmatprep.mubr.msk.bf16.mxu0 %vm3020_vm0, %v3019_v0 }
0x199d   :  { %2754 = vmatprep.subr.bf16.mxu0 %v3019_v0 }
0x19a0   :  { %2755 = vmatpush3.bf16.msra.mxu0 %v3190_v29 }
0x19a1   :  { %2768 = vmatprep.subr.bf16.mxu0 %v3019_v0 }
0x1a66   :  { %v1232_v1 = vpop.f32.mrb[36].mxu0 }
0x1a67   :  { %v1233_v49 = vadd.f32 %v1232_v1, %v1186_v46  ;;  %v2726_v6 = vpop.f32.mrb[37].mxu0 }
0x1a68   :  { %v1235_v8 = vpop.f32.mrb[38].mxu0 }
0x1a69   :  { %v1238_v2 = vadd.f32 %v3222_v41, %v1233_v49  ;;  %v2727_v11 = vpop.f32.mrb[39].mxu0 }
0x1a6a   :  { %v3532_v11 = vld [vmem:[%s3807_s23 + $0x8] sm:$0xff]  }
0x1a6b   :  { %v2429_v12 = vmul.f32 -1.442695, %v1238_v2 }
0x1a6d   :  { %2967 = vpow2.f32 %v2429_v12 }
0x1a6e   :  { %v1347_v13 = vpop.f32.mrb[40].mxu0 }
0x1a6f   :  { %v2742_v19 = vpop.f32.mrb[41].mxu0 }
0x1a70   :  { %v1350_v20 = vpop.f32.mrb[42].mxu0 }
0x1a71   :  { %v2743_v21 = vpop.f32.mrb[43].mxu0 }
0x1a77   :  { %v2968_v23 = vpop.eup %2967 }
0x1a78   :  { %v1242_v30 = vadd.f32 1.0, %v2968_v23 }
0x1a7a   :  { %2969 = vrcp.f32 %v1242_v30 }
0x1a84   :  { %v2970_v31 = vpop.eup %2969 }
0x1a85   :  { %v1245_v5 = vmul.f32 %v2970_v31, %v3148_v14 }
0x1a87   :  { %v1246_v34 = vadd.f32 %v3153_v16, %v1245_v5 }
0x1a89   :  { %1249 = vrot.lane.b32.xlu1 %v1246_v34, %s3021_s17  ;;  %v1247_v37 = vmul.f32 %v1246_v34, %v3423_v32 }
0x1afb   :  { %v1250_v35 = vpop.permute.xlu1 %1249 }
0x1afc   :  { %v1252_v36 = vmul.f32 %v1250_v35, %v1246_v34 }
0x1afe   :  { %1254 = vrot.lane.b32.xlu0 %v1252_v36, %s3022_s20 }
0x1b70   :  { %v1255_v39 = vpop.permute.xlu0 %1254 }
0x1b71   :  { %v3481_v40 = vadd.f32 %v1255_v39, %v1247_v37 }
0x1b73   :  { %2971 = vtanh.f32 %v3481_v40 }
0x1b7d   :  { %v2972_v42 = vpop.eup %2971 }
0x1b7e   :  { %1260 = vrot.lane.b32.xlu1 %v2972_v42, %s3021_s17 }
0x1bf0   :  { %v1261_v25 = vpop.permute.xlu1 %1260 }
0x1bf1   :  { %v1263_v22 = vmul.f32 %v1261_v25, %v1246_v34 }
0x1bf3   :  { %v1264_v45 = vpack.c.bf16 %v1263_v22, %v1263_v22 }
0x1bf5   :  { %1266 = vrot.lane.b32.xlu0 %v1264_v45, %s3022_s20 }
0x1c67   :  { %v3486_v46 = vpop.permute.xlu0 %1266 }
0x1c68   :  { %2733 = vmatmul.mubr.msk.bf16.vlgmr.msra.gmra.mrb[36].mxu1 %vm126_vm1, %v3486_v46 }
0x1c69   :  { %2745 = vmatpush3.bf16.msra.mxu1 %v3172_v26  ;;  %2748 = vmatprep.mubr.msk.bf16.mxu1 %vm3020_vm0, %v3019_v0 }
0x1c6a   :  { %2746 = vmatprep.subr.bf16.mxu1 %v3019_v0 }
0x1c6d   :  { %2747 = vmatpush3.bf16.msra.mxu1 %v3183_v28 }
0x1c6e   :  { %2760 = vmatprep.subr.bf16.mxu1 %v3019_v0 }
0x1c70   :  { %2749 = vmatmul.mubr.msk.bf16.vlgmr.msra.gmra.mrb[40].mxu1 %vm126_vm1, %v3486_v46 }
0x1c71   :  { %2761 = vmatpush3.bf16.msra.mxu1 %v3236_v63  ;;  %2764 = vmatprep.mubr.msk.bf16.mxu1 %vm3020_vm0, %v3019_v0 }
0x1c72   :  { %2762 = vmatprep.subr.bf16.mxu1 %v3019_v0 }
0x1c75   :  { %2763 = vmatpush3.bf16.msra.mxu1 %v3242_v3 }
0x1c76   :  { %2776 = vmatprep.subr.bf16.mxu1 %v3019_v0 }
0x1d3b   :  { %v1305_v26 = vpop.f32.mrb[36].mxu1 }
0x1d3c   :  { %v1311_v47 = vadd.f32 %v1305_v26, %v3448_v43  ;;  %v2734_v28 = vpop.f32.mrb[37].mxu1 }
0x1d3d   :  { %v1308_v48 = vpop.f32.mrb[38].mxu1 }
0x1d3e   :  { %v3506_v38 = vadd.f32 %v3270_v10, %v1311_v47  ;;  %v2735_v50 = vpop.f32.mrb[39].mxu1 }
0x1d40   :  { %v1353_v51 = vadd.f32 %v1347_v13, %v3506_v38 }
0x1d42   :  { %v2432_v52 = vmul.f32 -1.442695, %v1353_v51 }
0x1d43   :  { %v1414_v33 = vpop.f32.mrb[40].mxu1 }
0x1d44   :  { %2973 = vpow2.f32 %v2432_v52  ;;  %v2750_v53 = vpop.f32.mrb[41].mxu1 }
0x1d45   :  { %v1417_v54 = vpop.f32.mrb[42].mxu1  ;;  %v3014_v53 = vld [vmem:[%s3794_s7 + $0x8] sm:$0xff]  }
0x1d46   :  { %v2751_v44 = vpop.f32.mrb[43].mxu1 }
0x1d4e   :  { %v2974_v55 = vpop.eup %2973 }
0x1d4f   :  { %v1357_v56 = vadd.f32 1.0, %v2974_v55 }
0x1d51   :  { %2975 = vrcp.f32 %v1357_v56 }
0x1d5b   :  { %v2976_v58 = vpop.eup %2975 }
0x1d5c   :  { %v1360_v43 = vmul.f32 %v2976_v58, %v3148_v14 }
0x1d5e   :  { %v1361_v59 = vadd.f32 %v3153_v16, %v1360_v43 }
0x1d60   :  { %1364 = vrot.lane.b32.xlu1 %v1361_v59, %s3021_s17  ;;  %v1362_v4 = vmul.f32 %v1361_v59, %v3456_v57  ;;  %v3523_v57 = vld [vmem:[%s3807_s23] sm:$0xff]   ;;  %s3026_s23 = smov 80  }
0x1dd2   :  { %v1365_v60 = vpop.permute.xlu1 %1364 }
0x1dd3   :  { %v1367_v61 = vmul.f32 %v1365_v60, %v1361_v59 }
0x1dd5   :  { %1369 = vrot.lane.b32.xlu0 %v1367_v61, %s3022_s20 }
0x1e47   :  { %v1370_v1 = vpop.permute.xlu0 %1369 }
0x1e48   :  { %v3514_v49 = vadd.f32 %v1370_v1, %v1362_v4 }
0x1e4a   :  { %2977 = vtanh.f32 %v3514_v49 }
0x1e54   :  { %v2978_v6 = vpop.eup %2977 }
0x1e55   :  { %1375 = vrot.lane.b32.xlu1 %v2978_v6, %s3021_s17 }
0x1ec7   :  { %v1376_v8 = vpop.permute.xlu1 %1375 }
0x1ec8   :  { %v1378_v14 = vmul.f32 %v1376_v8, %v1361_v59 }
0x1eca   :  { %v1379_v2 = vpack.c.bf16 %v1378_v14, %v1378_v14 }
0x1ecc   :  { %1421 = vrot.lane.b32.xlu0 %v1379_v2, %s3022_s20 }
0x1f3e   :  { %v1422_v16 = vpop.permute.xlu0 %1421 }
0x1f3f   :  { %2757 = vmatmul.mubr.msk.bf16.vlgmr.msra.gmra.mrb[44].mxu0 %vm126_vm1, %v1422_v16 }
0x1f40   :  { %2769 = vmatpush3.bf16.msra.mxu0 %v3523_v57  ;;  %2772 = vmatprep.mubr.msk.bf16.mxu0 %vm3020_vm0, %v3019_v0 }
0x1f41   :  { %2770 = vmatprep.subr.bf16.mxu0 %v3019_v0 }
0x1f44   :  { %2771 = vmatpush3.bf16.msra.mxu0 %v3532_v11 }
0x1f45   :  { %2784 = vmatprep.subr.bf16.mxu0 %v3019_v0 }
0x1f47   :  { %2773 = vmatmul.mubr.msk.bf16.vlgmr.msra.gmra.mrb[48].mxu0 %vm126_vm1, %v1422_v16 }
0x1f48   :  { %2785 = vmatpush3.bf16.msra.mxu0 %v3177_v27  ;;  %2788 = vmatprep.mubr.msk.bf16.mxu0 %vm3020_vm0, %v3019_v0 }
0x1f49   :  { %2786 = vmatprep.subr.bf16.mxu0 %v3019_v0 }
0x1f4c   :  { %2787 = vmatpush3.bf16.msra.mxu0 %v3190_v29  ;;  %v3547_v29 = vld [vmem:[%s3791_s13] ss:$0 sm:$0xff] }
0x1f4d   :  { %2808 = vmatprep.subr.bf16.mxu0 %v3019_v0 }
0x2012   :  { %v1460_v12 = vpop.f32.mrb[44].mxu0 }
0x2013   :  { %v1461_v13 = vadd.f32 %v1460_v12, %v1414_v33  ;;  %v2758_v19 = vpop.f32.mrb[45].mxu0  ;;  %v3013_v33 = vld [vmem:[%s3794_s7] sm:$0xff]  }
0x2014   :  { %v1463_v20 = vpop.f32.mrb[46].mxu0 }
0x2015   :  { %v1466_v21 = vadd.f32 %v3222_v41, %v1461_v13  ;;  %v2759_v23 = vpop.f32.mrb[47].mxu0  ;;  %v3553_v41 = vld [vmem:[%s3792_s14] ss:$0 sm:$0xff] }
0x2017   :  { %v2435_v30 = vmul.f32 -1.442695, %v1466_v21 }
0x2019   :  { %2979 = vpow2.f32 %v2435_v30 }
0x201a   :  { %v1575_v31 = vpop.f32.mrb[48].mxu0 }
0x201b   :  { %v2774_v27 = vpop.f32.mrb[49].mxu0 }
0x201c   :  { %v1578_v5 = vpop.f32.mrb[50].mxu0 }
0x201d   :  { %v2775_v34 = vpop.f32.mrb[51].mxu0 }
0x201e   :  { %v3609_v34 = vld [vmem:[%s3797_s8] ss:$0 sm:$0xff] }
0x2023   :  { %v2980_v35 = vpop.eup %2979 }
0x2024   :  { %v1470_v36 = vadd.f32 1.0, %v2980_v35 }
0x2026   :  { %2981 = vrcp.f32 %v1470_v36 }
0x2030   :  { %v2982_v37 = vpop.eup %2981 }
0x2031   :  { %v1473_v39 = vmul.f32 %v3547_v29, %v2982_v37 }
0x2033   :  { %v1474_v42 = vadd.f32 %v3553_v41, %v1473_v39 }
0x2035   :  { %1477 = vrot.lane.b32.xlu1 %v1474_v42, %s3021_s17  ;;  %v1475_v45 = vmul.f32 %v1474_v42, %v3481_v40 }
0x20a7   :  { %v1478_v25 = vpop.permute.xlu1 %1477 }
0x20a8   :  { %v1480_v22 = vmul.f32 %v1478_v25, %v1474_v42 }
0x20aa   :  { %1482 = vrot.lane.b32.xlu0 %v1480_v22, %s3022_s20 }
0x211c   :  { %v1483_v26 = vpop.permute.xlu0 %1482 }
0x211d   :  { %v3559_v47 = vadd.f32 %v1483_v26, %v1475_v45 }
0x211f   :  { %2983 = vtanh.f32 %v3559_v47 }
0x2129   :  { %v2984_v28 = vpop.eup %2983 }
0x212a   :  { %1488 = vrot.lane.b32.xlu1 %v2984_v28, %s3021_s17 }
0x219c   :  { %v1489_v48 = vpop.permute.xlu1 %1488 }
0x219d   :  { %v1491_v50 = vmul.f32 %v1489_v48, %v1474_v42 }
0x219f   :  { %v1492_v51 = vpack.c.bf16 %v1491_v50, %v1491_v50 }
0x21a1   :  { %1494 = vrot.lane.b32.xlu0 %v1492_v51, %s3022_s20 }
0x2213   :  { %v3564_v52 = vpop.permute.xlu0 %1494 }
0x2214   :  { %2765 = vmatmul.mubr.msk.bf16.vlgmr.msra.gmra.mrb[44].mxu1 %vm126_vm1, %v3564_v52 }
0x2215   :  { %2777 = vmatpush3.bf16.msra.mxu1 %v3013_v33  ;;  %2780 = vmatprep.mubr.msk.bf16.mxu1 %vm3020_vm0, %v3019_v0 }
0x2216   :  { %2778 = vmatprep.subr.bf16.mxu1 %v3019_v0 }
0x2219   :  { %2779 = vmatpush3.bf16.msra.mxu1 %v3014_v53 }
0x221a   :  { %2792 = vmatprep.subr.bf16.mxu1 %v3019_v0 }
0x221c   :  { %2781 = vmatmul.mubr.msk.bf16.vlgmr.msra.gmra.mrb[48].mxu1 %vm126_vm1, %v3564_v52 }
0x221d   :  { %2793 = vmatpush3.bf16.msra.mxu1 %v3236_v63  ;;  %2796 = vmatprep.mubr.msk.bf16.mxu1 %vm3020_vm0, %v3019_v0 }
0x221e   :  { %2794 = vmatprep.subr.bf16.mxu1 %v3019_v0 }
0x2221   :  { %2795 = vmatpush3.bf16.msra.mxu1 %v3242_v3 }
0x2222   :  { %2800 = vmatprep.subr.bf16.mxu1 %v3019_v0 }
0x22e7   :  { %v1533_v54 = vpop.f32.mrb[44].mxu1 }
0x22e8   :  { %v1539_v44 = vadd.f32 %v1533_v54, %v3506_v38  ;;  %v2766_v55 = vpop.f32.mrb[45].mxu1 }
0x22e9   :  { %v1536_v56 = vpop.f32.mrb[46].mxu1 }
0x22ea   :  { %v3588_v58 = vadd.f32 %v3270_v10, %v1539_v44  ;;  %v2767_v43 = vpop.f32.mrb[47].mxu1  ;;  %v3016_v56 = vld [vmem:[%s3795_s6] sm:$0xff]  }
0x22eb   :  { %v3643_v43 = vld [vmem:[%s3800_s11] sm:$0xff]  }
0x22ec   :  { %v1581_v63 = vadd.f32 %v1575_v31, %v3588_v58 }
0x22ee   :  { %v2438_v59 = vmul.f32 -1.442695, %v1581_v63 }
0x22ef   :  { %v1642_v60 = vpop.f32.mrb[48].mxu1 }
0x22f0   :  { %2985 = vpow2.f32 %v2438_v59  ;;  %v2782_v61 = vpop.f32.mrb[49].mxu1 }
0x22f1   :  { %v1645_v4 = vpop.f32.mrb[50].mxu1 }
0x22f2   :  { %v2783_v1 = vpop.f32.mrb[51].mxu1 }
0x22fa   :  { %v2986_v3 = vpop.eup %2985 }
0x22fb   :  { %v1585_v6 = vadd.f32 1.0, %v2986_v3 }
0x22fd   :  { %2987 = vrcp.f32 %v1585_v6 }
0x2307   :  { %v2988_v8 = vpop.eup %2987 }
0x2308   :  { %v1588_v38 = vmul.f32 %v3547_v29, %v2988_v8 }
0x230a   :  { %v1589_v14 = vadd.f32 %v3553_v41, %v1588_v38 }
0x230c   :  { %1592 = vrot.lane.b32.xlu1 %v1589_v14, %s3021_s17  ;;  %v1590_v16 = vmul.f32 %v1589_v14, %v3514_v49 }
0x237e   :  { %v1593_v10 = vpop.permute.xlu1 %1592 }
0x237f   :  { %v1595_v2 = vmul.f32 %v1593_v10, %v1589_v14 }
0x2381   :  { %1597 = vrot.lane.b32.xlu0 %v1595_v2, %s3022_s20 }
0x23f3   :  { %v1598_v12 = vpop.permute.xlu0 %1597 }
0x23f4   :  { %v3596_v13 = vadd.f32 %v1598_v12, %v1590_v16 }
0x23f6   :  { %2989 = vtanh.f32 %v3596_v13 }
0x2400   :  { %v2990_v19 = vpop.eup %2989 }
0x2401   :  { %1603 = vrot.lane.b32.xlu1 %v2990_v19, %s3021_s17 }
0x2473   :  { %v1604_v20 = vpop.permute.xlu1 %1603 }
0x2474   :  { %v1606_v21 = vmul.f32 %v1604_v20, %v1589_v14 }
0x2476   :  { %v1607_v23 = vpack.c.bf16 %v1606_v21, %v1606_v21 }
0x2478   :  { %1649 = vrot.lane.b32.xlu0 %v1607_v23, %s3022_s20 }
0x24ea   :  { %v1650_v30 = vpop.permute.xlu0 %1649 }
0x24eb   :  { %2789 = vmatmul.mubr.msk.bf16.vlgmr.msra.gmra.mrb[52].mxu0 %vm126_vm1, %v1650_v30 }
0x24ec   :  { %2809 = vmatpush3.bf16.msra.mxu0 %v3013_v33  ;;  %2812 = vmatprep.mubr.msk.bf16.mxu0 %vm3020_vm0, %v3019_v0 }
0x24ed   :  { %2810 = vmatprep.subr.bf16.mxu0 %v3019_v0 }
0x24f0   :  { %2811 = vmatpush3.bf16.msra.mxu0 %v3014_v53 }
0x24f1   :  { %2816 = vmatprep.subr.bf16.mxu0 %v3019_v0 }
0x25be   :  { %v1688_v49 = vpop.f32.mrb[52].mxu0 }
0x25bf   :  { %v1689_v31 = vadd.f32 %v1688_v49, %v1642_v60  ;;  %v2790_v27 = vpop.f32.mrb[53].mxu0 }
0x25c0   :  { %v1691_v5 = vpop.f32.mrb[54].mxu0 }
0x25c1   :  { %v1694_v35 = vadd.f32 %v3609_v34, %v1689_v31  ;;  %v2791_v36 = vpop.f32.mrb[55].mxu0 }
0x25c3   :  { %v2441_v37 = vmul.f32 -1.442695, %v1694_v35 }
0x25c5   :  { %2991 = vpow2.f32 %v2441_v37 }
0x25cf   :  { %v2992_v39 = vpop.eup %2991 }
0x25d0   :  { %v1698_v42 = vadd.f32 1.0, %v2992_v39 }
0x25d2   :  { %2993 = vrcp.f32 %v1698_v42 }
0x25dc   :  { %v2994_v25 = vpop.eup %2993 }
0x25dd   :  { %v1701_v22 = vmul.f32 %v3547_v29, %v2994_v25 }
0x25df   :  { %v1702_v45 = vadd.f32 %v3553_v41, %v1701_v22 }
0x25e1   :  { %1705 = vrot.lane.b32.xlu1 %v1702_v45, %s3021_s17  ;;  %v1703_v48 = vmul.f32 %v1702_v45, %v3559_v47 }
0x2653   :  { %v1706_v26 = vpop.permute.xlu1 %1705 }
0x2654   :  { %v1708_v28 = vmul.f32 %v1706_v26, %v1702_v45 }
0x2656   :  { %1710 = vrot.lane.b32.xlu0 %v1708_v28, %s3022_s20 }
0x26c8   :  { %v1711_v50 = vpop.permute.xlu0 %1710 }
0x26c9   :  { %v3617_v51 = vadd.f32 %v1711_v50, %v1703_v48 }
0x26cb   :  { %2995 = vtanh.f32 %v3617_v51 }
0x26d5   :  { %v2996_v33 = vpop.eup %2995 }
0x26d6   :  { %1716 = vrot.lane.b32.xlu1 %v2996_v33, %s3021_s17 }
0x2748   :  { %v1717_v53 = vpop.permute.xlu1 %1716 }
0x2749   :  { %v1719_v54 = vmul.f32 %v1717_v53, %v1702_v45 }
0x274b   :  { %v1720_v44 = vpack.c.bf16 %v1719_v54, %v1719_v54 }
0x274d   :  { %1722 = vrot.lane.b32.xlu0 %v1720_v44, %s3022_s20  ;;  %v3736_v44 = vld [vmem:[%s3801_s12] ss:$0 sm:$0xff]  ;;  %s3024_s12 = smov 48  }
0x27bf   :  { %v1723_v55 = vpop.permute.xlu0 %1722 }
0x27c0   :  { %2797 = vmatmul.mubr.msk.bf16.vlgmr.msra.gmra.mrb[52].mxu1 %vm126_vm1, %v1723_v55  ;;  %2813 = vmatmul.mubr.msk.bf16.vlgmr.msra.gmra.mrb[56].mxu0 %vm126_vm1, %v1723_v55 }
0x27c1   :  { %2801 = vmatpush3.bf16.msra.mxu1 %v3523_v57  ;;  %2804 = vmatprep.mubr.msk.bf16.mxu1 %vm3020_vm0, %v3019_v0  ;;  %v3017_v57 = vld [vmem:[%s3795_s6 + $0x8] sm:$0xff]  }
0x27c2   :  { %2802 = vmatprep.subr.bf16.mxu1 %v3019_v0  ;;  %2817 = vmatpush3.bf16.msra.mxu0 %v3016_v56 }
0x27c3   :  { %2818 = vmatprep.subr.bf16.mxu0 %v3019_v0  ;;  %2820 = vmatprep.mubr.msk.bf16.mxu0 %vm3020_vm0, %v3019_v0 }
0x27c5   :  { %2803 = vmatpush3.bf16.msra.mxu1 %v3532_v11  ;;  %v3650_v11 = vld [vmem:[%s3800_s11 + $0x8] sm:$0xff]  }
0x27c6   :  { %2824 = vmatprep.subr.bf16.mxu1 %v3019_v0  ;;  %2819 = vmatpush3.bf16.msra.mxu0 %v3017_v57 }
0x27c7   :  { %2832 = vmatprep.subr.bf16.mxu0 %v3019_v0 }
0x27cc   :  { %2805 = vmatmul.mubr.msk.bf16.vlgmr.msra.gmra.mrb[52].mxu1 %vm126_vm1, %v1650_v30 }
0x27cd   :  { %2825 = vmatpush3.bf16.msra.mxu1 %v3643_v43  ;;  %2828 = vmatprep.mubr.msk.bf16.mxu1 %vm3020_vm0, %v3019_v0 }
0x27ce   :  { %2826 = vmatprep.subr.bf16.mxu1 %v3019_v0 }
0x27d1   :  { %2827 = vmatpush3.bf16.msra.mxu1 %v3650_v11 }
0x27d2   :  { %2840 = vmatprep.subr.bf16.mxu1 %v3019_v0 }
0x27d4   :  { %2829 = vmatmul.mubr.msk.bf16.vlgmr.msra.gmra.mrb[56].mxu1 %vm126_vm1, %v3249_v9 }
0x27d5   :  { %2841 = vmatpush3.bf16.msra.mxu1 %v3643_v43  ;;  %2844 = vmatprep.mubr.msk.bf16.mxu1 %vm3020_vm0, %v3019_v0 }
0x27d6   :  { %2842 = vmatprep.subr.bf16.mxu1 %v3019_v0 }
0x27d9   :  { %2843 = vmatpush3.bf16.msra.mxu1 %v3650_v11 }
0x27da   :  { %2856 = vmatprep.subr.bf16.mxu1 %v3019_v0 }
0x27dc   :  { %2845 = vmatmul.mubr.msk.bf16.vlgmr.msra.gmra.mrb[60].mxu1 %vm126_vm1, %v3370_v24 }
0x27dd   :  { %2857 = vmatpush3.bf16.msra.mxu1 %v3643_v43  ;;  %2860 = vmatprep.mubr.msk.bf16.mxu1 %vm3020_vm0, %v3019_v0 }
0x27de   :  { %2858 = vmatprep.subr.bf16.mxu1 %v3019_v0 }
0x27e1   :  { %2859 = vmatpush3.bf16.msra.mxu1 %v3650_v11 }
0x27e2   :  { %2872 = vmatprep.subr.bf16.mxu1 %v3019_v0 }
0x27e4   :  { %2861 = vmatmul.mubr.msk.bf16.vlgmr.msra.gmra.mrb[64].mxu1 %vm126_vm1, %v3486_v46  ;;  %v3018_v46 = vld [vmem:[%s3799_s10] ss:$0 sm:$0xff] }
0x27e5   :  { %2873 = vmatpush3.bf16.msra.mxu1 %v3643_v43  ;;  %2876 = vmatprep.mubr.msk.bf16.mxu1 %vm3020_vm0, %v3019_v0  ;;  %v2888_v60 = vadd.f32 %v3018_v46, %v3588_v58 }
0x27e6   :  { %2874 = vmatprep.subr.bf16.mxu1 %v3019_v0 }
0x27e9   :  { %2875 = vmatpush3.bf16.msra.mxu1 %v3650_v11 }
0x27ec   :  { %2877 = vmatmul.mubr.msk.bf16.vlgmr.msra.gmra.mrb[68].mxu1 %vm126_vm1, %v1723_v55 }
0x2893   :  { %v3681_v9 = vpop.f32.mrb[56].mxu0 }
0x2894   :  { %v2814_v24 = vpop.f32.mrb[57].mxu0 }
0x2895   :  { %v1873_v63 = vpop.f32.mrb[58].mxu0 }
0x2896   :  { %v2815_v59 = vpop.f32.mrb[59].mxu0 }
0x289f   :  { %v1803_v61 = vpop.f32.mrb[52].mxu1 }
0x28a0   :  { %v2889_v4 = vadd.f32 %v2888_v60, %v1803_v61  ;;  %v2806_v1 = vpop.f32.mrb[53].mxu1 }
0x28a1   :  { %v1806_v3 = vpop.f32.mrb[54].mxu1 }
0x28a2   :  { %v2444_v6 = vmul.f32 -1.442695, %v2889_v4  ;;  %v2807_v8 = vpop.f32.mrb[55].mxu1 }
0x28a4   :  { %2997 = vpow2.f32 %v2444_v6 }
0x28a7   :  { %v3687_v38 = vpop.f32.mrb[56].mxu1 }
0x28a8   :  { %v2830_v14 = vpop.f32.mrb[57].mxu1  ;;  %v1997_v57 = vadd.f32 %v3736_v44, %v3687_v38 }
0x28a9   :  { %v1999_v10 = vpop.f32.mrb[58].mxu1 }
0x28aa   :  { %v2831_v2 = vpop.f32.mrb[59].mxu1 }
0x28ae   :  { %v2998_v16 = vpop.eup %2997 }
0x28af   :  { %v1813_v12 = vadd.f32 1.0, %v2998_v16  ;;  %v3689_v19 = vpop.f32.mrb[60].mxu1 }
0x28b0   :  { %v2846_v20 = vpop.f32.mrb[61].mxu1 }
0x28b1   :  { %2999 = vrcp.f32 %v1813_v12  ;;  %v2081_v21 = vpop.f32.mrb[62].mxu1 }
0x28b2   :  { %v2847_v58 = vpop.f32.mrb[63].mxu1 }
0x28b7   :  { %v3691_v23 = vpop.f32.mrb[64].mxu1 }
0x28b8   :  { %v2862_v30 = vpop.f32.mrb[65].mxu1  ;;  %v2161_v14 = vadd.f32 %v3736_v44, %v3691_v23 }
0x28b9   :  { %v2163_v49 = vpop.f32.mrb[66].mxu1 }
0x28ba   :  { %v2863_v31 = vpop.f32.mrb[67].mxu1 }
0x28bb   :  { %v3000_v27 = vpop.eup %2999 }
0x28bc   :  { %v1816_v5 = vmul.f32 %v3547_v29, %v3000_v27 }
0x28be   :  { %v1817_v35 = vadd.f32 %v3553_v41, %v1816_v5 }
0x28bf   :  { %v3695_v36 = vpop.f32.mrb[68].mxu1 }
0x28c0   :  { %1820 = vrot.lane.b32.xlu1 %v1817_v35, %s3021_s17  ;;  %v2878_v37 = vpop.f32.mrb[69].mxu1  ;;  %v1818_v45 = vmul.f32 %v1817_v35, %v3596_v13 }
0x28c1   :  { %v2245_v39 = vpop.f32.mrb[70].mxu1 }
0x28c2   :  { %v2879_v42 = vpop.f32.mrb[71].mxu1 }
0x2932   :  { %v1821_v25 = vpop.permute.xlu1 %1820 }
0x2933   :  { %v1823_v22 = vmul.f32 %v1821_v25, %v1817_v35 }
0x2935   :  { %1825 = vrot.lane.b32.xlu0 %v1823_v22, %s3022_s20 }
0x29a7   :  { %v1826_v26 = vpop.permute.xlu0 %1825 }
0x29a8   :  { %v1828_v28 = vadd.f32 %v1826_v26, %v1818_v45 }
0x29aa   :  { %3001 = vtanh.f32 %v1828_v28 }
0x29b4   :  { %v3002_v48 = vpop.eup %3001 }
0x29b5   :  { %1831 = vrot.lane.b32.xlu1 %v3002_v48, %s3021_s17 }
0x2a27   :  { %v1832_v50 = vpop.permute.xlu1 %1831 }
0x2a28   :  { %v1834_v33 = vmul.f32 %v1832_v50, %v1817_v35 }
0x2a2a   :  { %v1835_v53 = vpack.c.bf16 %v1834_v33, %v1834_v33 }
0x2a2c   :  { %1877 = vrot.lane.b32.xlu0 %v1835_v53, %s3022_s20 }
0x2a9e   :  { %v1878_v54 = vpop.permute.xlu0 %1877 }
0x2a9f   :  { %2821 = vmatmul.mubr.msk.bf16.vlgmr.msra.gmra.mrb[60].mxu0 %vm126_vm1, %v1878_v54 }
0x2aa0   :  { %2833 = vmatpush3.bf16.msra.mxu0 %v3643_v43  ;;  %2836 = vmatprep.mubr.msk.bf16.mxu0 %vm3020_vm0, %v3019_v0 }
0x2aa1   :  { %2834 = vmatprep.subr.bf16.mxu0 %v3019_v0 }
0x2aa4   :  { %2835 = vmatpush3.bf16.msra.mxu0 %v3650_v11 }
0x2aa5   :  { %2848 = vmatprep.subr.bf16.mxu0 %v3019_v0 }
0x2aa7   :  { %2837 = vmatmul.mubr.msk.bf16.vlgmr.msra.gmra.mrb[64].mxu0 %vm126_vm1, %v3312_v15 }
0x2aa8   :  { %2849 = vmatpush3.bf16.msra.mxu0 %v3643_v43  ;;  %2852 = vmatprep.mubr.msk.bf16.mxu0 %vm3020_vm0, %v3019_v0 }
0x2aa9   :  { %2850 = vmatprep.subr.bf16.mxu0 %v3019_v0 }
0x2aac   :  { %2851 = vmatpush3.bf16.msra.mxu0 %v3650_v11 }
0x2aad   :  { %2864 = vmatprep.subr.bf16.mxu0 %v3019_v0 }
0x2aaf   :  { %2853 = vmatmul.mubr.msk.bf16.vlgmr.msra.gmra.mrb[68].mxu0 %vm126_vm1, %v3428_v17 }
0x2ab0   :  { %2865 = vmatpush3.bf16.msra.mxu0 %v3643_v43  ;;  %2868 = vmatprep.mubr.msk.bf16.mxu0 %vm3020_vm0, %v3019_v0 }
0x2ab1   :  { %2866 = vmatprep.subr.bf16.mxu0 %v3019_v0 }
0x2ab4   :  { %2867 = vmatpush3.bf16.msra.mxu0 %v3650_v11 }
0x2ab5   :  { %2880 = vmatprep.subr.bf16.mxu0 %v3019_v0 }
0x2ab7   :  { %2869 = vmatmul.mubr.msk.bf16.vlgmr.msra.gmra.mrb[72].mxu0 %vm126_vm1, %v3564_v52 }
0x2ab8   :  { %2881 = vmatpush3.bf16.msra.mxu0 %v3643_v43  ;;  %2884 = vmatprep.mubr.msk.bf16.mxu0 %vm3020_vm0, %v3019_v0 }
0x2ab9   :  { %2882 = vmatprep.subr.bf16.mxu0 %v3019_v0  ;;  %v1949_v0 = vld [vmem:[%s3802_s3] sm:$0x3]  ;;  %s3023_s3 = smov 16  }
0x2abc   :  { %2883 = vmatpush3.bf16.msra.mxu0 %v3650_v11 }
0x2b72   :  { %v1916_v15 = vpop.f32.mrb[60].mxu0 }
0x2b73   :  { %v1917_v17 = vadd.f32 %v1916_v15, %v3681_v9  ;;  %v2822_v13 = vpop.f32.mrb[61].mxu0  ;;  %v3744_v9 = vadd.f32 %v1997_v57, %v1949_v0 }
0x2b74   :  { %v1919_v55 = vpop.f32.mrb[62].mxu0 }
0x2b75   :  { %v1922_v52 = vadd.f32 %v3609_v34, %v1917_v17  ;;  %v2823_v56 = vpop.f32.mrb[63].mxu0  ;;  %v2079_v34 = vadd.f32 %v3736_v44, %v3689_v19 }
0x2b77   :  { %v2447_v43 = vmul.f32 -1.442695, %v1922_v52 }
0x2b79   :  { %3003 = vpow2.f32 %v2447_v43 }
0x2b7a   :  { %v2037_v11 = vpop.f32.mrb[64].mxu0 }
0x2b7b   :  { %v2038_v24 = vadd.f32 %v3736_v44, %v2037_v11  ;;  %v2838_v63 = vpop.f32.mrb[65].mxu0 }
0x2b7c   :  { %v2040_v59 = vpop.f32.mrb[66].mxu0 }
0x2b7d   :  { %v2043_v46 = vadd.f32 %v2038_v24, %v3744_v9  ;;  %v2839_v60 = vpop.f32.mrb[67].mxu0 }
0x2b7f   :  { %v2084_v61 = vadd.f32 %v2079_v34, %v2043_v46 }
0x2b82   :  { %v2119_v4 = vpop.f32.mrb[68].mxu0 }
0x2b83   :  { %v3004_v1 = vpop.eup %3003  ;;  %v2120_v3 = vadd.f32 %v3736_v44, %v2119_v4  ;;  %v2854_v6 = vpop.f32.mrb[69].mxu0 }
0x2b84   :  { %v1926_v8 = vadd.f32 1.0, %v3004_v1  ;;  %v2122_v38 = vpop.f32.mrb[70].mxu0 }
0x2b85   :  { %v2125_v10 = vadd.f32 %v2120_v3, %v2084_v61  ;;  %v2855_v2 = vpop.f32.mrb[71].mxu0 }
0x2b86   :  { %3005 = vrcp.f32 %v1926_v8 }
0x2b87   :  { %v2166_v16 = vadd.f32 %v2161_v14, %v2125_v10 }
0x2b8a   :  { %v2201_v12 = vpop.f32.mrb[72].mxu0 }
0x2b8b   :  { %v2870_v19 = vpop.f32.mrb[73].mxu0 }
0x2b8c   :  { %v2204_v20 = vpop.f32.mrb[74].mxu0 }
0x2b8d   :  { %v2871_v21 = vpop.f32.mrb[75].mxu0 }
0x2b90   :  { %v3006_v58 = vpop.eup %3005 }
0x2b91   :  { %v1929_v30 = vmul.f32 %v3547_v29, %v3006_v58  ;;  %v2202_v29 = vadd.f32 %v3736_v44, %v2201_v12 }
0x2b93   :  { %v1930_v49 = vadd.f32 %v3553_v41, %v1929_v30  ;;  %v2207_v41 = vadd.f32 %v2202_v29, %v2166_v16 }
0x2b95   :  { %1933 = vrot.lane.b32.xlu1 %v1930_v49, %s3021_s17  ;;  %v1931_v23 = vmul.f32 %v1930_v49, %v3617_v51 }
0x2c07   :  { %v1934_v31 = vpop.permute.xlu1 %1933 }
0x2c08   :  { %v1936_v27 = vmul.f32 %v1934_v31, %v1930_v49 }
0x2c0a   :  { %1938 = vrot.lane.b32.xlu0 %v1936_v27, %s3022_s20 }
0x2c7c   :  { %v1939_v5 = vpop.permute.xlu0 %1938 }
0x2c7d   :  { %v1941_v35 = vadd.f32 %v1939_v5, %v1931_v23 }
0x2c7f   :  { %3007 = vtanh.f32 %v1941_v35 }
0x2c89   :  { %v3008_v37 = vpop.eup %3007 }
0x2c8a   :  { %1944 = vrot.lane.b32.xlu1 %v3008_v37, %s3021_s17 }
0x2c8e   :  { %2297 = vrot.lane.b32.xlu1 %v2043_v46, %s3023_s3 }
0x2c92   :  { %2305 = vrot.lane.b32.xlu1 %v2125_v10, %s3024_s12 }
0x2c96   :  { %2351 = vrot.lane.b32.xlu1 %v3481_v40, %s3025_s25 }
0x2c9a   :  { %2343 = vrot.lane.b32.xlu1 %v3365_v18, %s3022_s20  ;;  %v2243_v18 = vadd.f32 %v3736_v44, %v3695_v36 }
0x2c9c   :  { %v2248_v40 = vadd.f32 %v2243_v18, %v2207_v41 }
0x2c9e   :  { %2313 = vrot.lane.b32.xlu1 %v2207_v41, %s3026_s23 }
0x2ca2   :  { %2359 = vrot.lane.b32.xlu1 %v1941_v35, %s3021_s17 }
0x2cfc   :  { %v1945_v39 = vpop.permute.xlu1 %1944 }
0x2cfd   :  { %v1947_v42 = vmul.f32 %v1945_v39, %v1930_v49 }
0x2cff   :  { %v1948_v25 = vpack.c.bf16 %v1947_v42, %v1947_v42 }
0x2d00   :  { %v2298_v22 = vpop.permute.xlu1 %2297 }
0x2d01   :  { %2250 = vrot.lane.b32.xlu0 %v1948_v25, %s3022_s20  ;;  %v2325_v28 = vsel %vm2324_vm2, %v3744_v9, %v2298_v22 }
0x2d04   :  { %v2306_v45 = vpop.permute.xlu1 %2305 }
0x2d05   :  { %2301 = vrot.lane.b32.xlu0 %v2084_v61, %s3022_s20 }
0x2d09   :  { %2339 = vrot.lane.b32.xlu0 %v3230_v62, %s3025_s25  ;;  %v2352_v62 = vpop.permute.xlu1 %2351 }
0x2d0a   :  { %v2365_v17 = vsel %vm126_vm1, %v2352_v62, %v3559_v47 }
0x2d0d   :  { %2309 = vrot.lane.b32.xlu0 %v2166_v16, %s3021_s17  ;;  %v2344_v50 = vpop.permute.xlu1 %2343 }
0x2d11   :  { %2355 = vrot.lane.b32.xlu0 %v3617_v51, %s3022_s20  ;;  %v2314_v54 = vpop.permute.xlu1 %2313 }
0x2d15   :  { %2347 = vrot.lane.b32.xlu0 %v3423_v32, %s3021_s17  ;;  %v2360_v52 = vpop.permute.xlu1 %2359 }
0x2d19   :  { %2317 = vrot.lane.b32.xlu0 %v2248_v40, %s3025_s25 }
0x2d73   :  { %v2251_v26 = vpop.permute.xlu0 %2250 }
0x2d74   :  { %2885 = vmatmul.mubr.msk.bf16.vlgmr.msra.gmra.mrb[76].mxu0 %vm126_vm1, %v2251_v26 }
0x2d77   :  { %v2302_v48 = vpop.permute.xlu0 %2301 }
0x2d78   :  { %v2326_v51 = vsel %vm126_vm1, %v2325_v28, %v2302_v48 }
0x2d79   :  { %v2328_v36 = vsel %vm2327_vm3, %v2326_v51, %v2306_v45 }
0x2d7b   :  { %v2340_v33 = vpop.permute.xlu0 %2339 }
0x2d7c   :  { %v2362_v13 = vsel %vm126_vm1, %v2340_v33, %v3307_v7 }
0x2d7d   :  { %v2363_v56 = vsel %vm2329_vm4, %v2362_v13, %v2344_v50 }
0x2d7f   :  { %v2310_v32 = vpop.permute.xlu0 %2309 }
0x2d80   :  { %v2330_v53 = vsel %vm2329_vm4, %v2328_v36, %v2310_v32 }
0x2d81   :  { %v2332_v9 = vsel %vm2331_vm6, %v2330_v53, %v2314_v54 }
0x2d83   :  { %v2356_v15 = vpop.permute.xlu0 %2355 }
0x2d84   :  { %v2366_v55 = vsel %vm2329_vm4, %v2365_v17, %v2356_v15 }
0x2d85   :  { %v2367_v0 = vsel %vm2333_vm5, %v2366_v55, %v2360_v52 }
0x2d87   :  { %v2348_v57 = vpop.permute.xlu0 %2347 }
0x2d88   :  { %v2364_v43 = vsel %vm2333_vm5, %v2363_v56, %v2348_v57 }
0x2d89   :  { %v2370_v11 = vcombine.low %v2364_v43, %v2367_v0 }
0x2d8b   :  { %2458 = vst.sshfl [vmem:[%s3803_s16] sm:$0x33 pattern:$0x76325410] %v2370_v11  ;;  %v2318_v24 = vpop.permute.xlu0 %2317 }
0x2d8c   :  { %v2334_v63 = vsel %vm2333_vm5, %v2332_v9, %v2318_v24 }
0x2e47   :  { %v2289_v47 = vpop.f32.mrb[76].mxu0 }
0x2e48   :  { %v2290_v59 = vadd.f32 %v3736_v44, %v2289_v47  ;;  %v2886_v7 = vpop.f32.mrb[77].mxu0 }
0x2e49   :  { %v2292_v34 = vpop.f32.mrb[78].mxu0 }
0x2e4a   :  { %v2295_v46 = vadd.f32 %v2290_v59, %v2248_v40  ;;  %v2887_v60 = vpop.f32.mrb[79].mxu0 }
0x2e4c   :  { %2321 = vrot.lane.b32.xlu1 %v2295_v46, %s3027_s26 }
0x2ebe   :  { %v2322_v61 = vpop.permute.xlu1 %2321 }
0x2ebf   :  { %v2336_v4 = vsel %vm2335_vm7, %v2334_v63, %v2322_v61 }
0x2ec0   :  { %2337 = vst [vmem:[%s3804_s15] sm:$0x3] %v2336_v4 }

</bundles_post_ra>
